<compile_context>
chip_gen: v7x
topology: tpu7x:2x2x1
jax: 0.10.0
libtpu: 0.0.40
codegen_flags: <defaults>
</compile_context>

<pallas_src>
import functools

import jax
import jax.numpy as jnp
from jax.experimental import pallas as pl
from jax.experimental.pallas import tpu as pltpu


_BN_EPS = 1e-5


def _round_up(x, m):
    return (x + m - 1) // m * m


# --------------------------------------------------------------------------
# Fused Pallas kernel: conv1+BN+ReLU -> conv2+BN+ReLU -> conv3+BN+res+ReLU
# --------------------------------------------------------------------------
def _fused_resblock_kernel(x_ref, w1_ref, s1_ref, b1_ref,
                           w2_ref, s2_ref, b2_ref,
                           w3_ref, s3_ref, b3_ref,
                           mask_ref, out_ref, buf1, buf2,
                           *, base, mp, wp):
    """All spatial buffers are (C, mext) with the real (padded-by-1) image
    occupying lanes [base, base+mp); everything outside that window is zero.

    A SAME 3x3 conv is then 9 shifted dot-accumulates with flat lane offsets
    (dy-1)*wp + (dx-1)."""

    def conv9(src_ref, w_ref):
        acc = None
        for k in range(9):
            dy, dx = divmod(k, 3)
            off = base + (dy - 1) * wp + (dx - 1)
            xs = src_ref[:, off:off + mp].astype(jnp.bfloat16)       # (Cs, mp)
            t = jnp.dot(w_ref[k], xs, preferred_element_type=jnp.float32)
            acc = t if acc is None else acc + t
        return acc                                                    # (Cout, mp) f32

    m = mask_ref[...]                                                 # (1, mp) interior mask

    # ---- stage 1: conv1 + BN + ReLU -> buf1 (VMEM) -----------------------
    buf1[...] = jnp.zeros_like(buf1)
    h1 = jnp.maximum(conv9(x_ref, w1_ref) * s1_ref[...] + b1_ref[...], 0.0)
    buf1[:, base:base + mp] = h1 * m        # zero the 1-pixel ring (= conv zero padding)

    # ---- stage 2: conv2 + BN + ReLU -> buf2 (VMEM) -----------------------
    buf2[...] = jnp.zeros_like(buf2)
    h2 = jnp.maximum(conv9(buf1, w2_ref) * s2_ref[...] + b2_ref[...], 0.0)
    buf2[:, base:base + mp] = h2 * m

    # ---- stage 3: conv3 + BN + residual + ReLU -> out --------------------
    res = x_ref[:, base:base + mp]                                    # identity (f32)
    y = jnp.maximum(conv9(buf2, w3_ref) * s3_ref[...] + b3_ref[...] + res, 0.0)
    out_ref[...] = y.astype(out_ref.dtype)


# --------------------------------------------------------------------------
# Wrapper: layout glue + pallas_call
# --------------------------------------------------------------------------
def _fold_weight(w_hwio):
    # (3,3,Cin,Cout) -> (9, Cout, Cin), k = dy*3 + dx, bf16 for the MXU.
    kh, kw, cin, cout = w_hwio.shape
    return (jnp.transpose(w_hwio, (0, 1, 3, 2))
            .reshape(kh * kw, cout, cin)
            .astype(jnp.bfloat16))


def residual_block_pallas(params, x_nchw):
    N, C, H, W = x_nchw.shape
    Cmid = params["w1"].shape[-1]

    hp, wp = H + 2, W + 2                 # spatial grid padded by 1 (SAME conv)
    mp = hp * wp                          # flattened padded-image length
    base = _round_up(wp + 1, 128)         # lane-aligned start of the image window
    mext = _round_up(base + mp + wp + 1, 128)

    # NCHW -> (N, C, mext): pad H/W by 1 with zeros, flatten, add flat halo.
    xp = jnp.pad(x_nchw, ((0, 0), (0, 0), (1, 1), (1, 1))).reshape(N, C, mp)
    x_ext = jnp.pad(xp, ((0, 0), (0, 0), (base, mext - base - mp))).astype(jnp.float32)

    # Interior mask on the padded grid (1 for real pixels, 0 for the ring).
    pidx = jnp.arange(mp, dtype=jnp.int32)
    rr, cc = pidx // wp, pidx % wp
    mask = (((rr >= 1) & (rr <= H) & (cc >= 1) & (cc <= W))
            .astype(jnp.float32).reshape(1, mp))

    w1, w2, w3 = (_fold_weight(params[k]) for k in ("w1", "w2", "w3"))
    s1 = params["s1"].reshape(Cmid, 1).astype(jnp.float32)
    b1 = params["b1"].reshape(Cmid, 1).astype(jnp.float32)
    s2 = params["s2"].reshape(Cmid, 1).astype(jnp.float32)
    b2 = params["b2"].reshape(Cmid, 1).astype(jnp.float32)
    s3 = params["s3"].reshape(C, 1).astype(jnp.float32)
    b3 = params["b3"].reshape(C, 1).astype(jnp.float32)

    kernel = functools.partial(_fused_resblock_kernel, base=base, mp=mp, wp=wp)

    flops = 2 * N * H * W * 9 * (C * Cmid + Cmid * Cmid + Cmid * C)
    bytes_accessed = (4 * (x_ext.size + N * C * mp + mask.size)
                      + 2 * (w1.size + w2.size + w3.size)
                      + 4 * (s1.size + b1.size + s2.size + b2.size + s3.size + b3.size))

    def full3(shape):
        return pl.BlockSpec(shape, lambda n: (0, 0, 0))

    def full2(shape):
        return pl.BlockSpec(shape, lambda n: (0, 0))

    in_specs = [
        pl.BlockSpec((None, C, mext), lambda n: (n, 0, 0)),   # x (per-image slab)
        full3(w1.shape), full2(s1.shape), full2(b1.shape),
        full3(w2.shape), full2(s2.shape), full2(b2.shape),
        full3(w3.shape), full2(s3.shape), full2(b3.shape),
        full2(mask.shape),
    ]

    out_flat = pl.pallas_call(
        kernel,
        out_shape=jax.ShapeDtypeStruct((N, C, mp), x_nchw.dtype),
        grid=(N,),
        in_specs=in_specs,
        out_specs=pl.BlockSpec((None, C, mp), lambda n: (n, 0, 0)),
        scratch_shapes=[
            pltpu.VMEM((Cmid, mext), jnp.float32),   # h1
            pltpu.VMEM((Cmid, mext), jnp.float32),   # h2
        ],
        compiler_params=pltpu.CompilerParams(dimension_semantics=("parallel",)),
        cost_estimate=pl.CostEstimate(flops=flops, transcendentals=0,
                                      bytes_accessed=bytes_accessed),
    )(x_ext, w1, s1, b1, w2, s2, b2, w3, s3, b3, mask)

    # (N, C, mp) -> (N, C, H, W): drop the 1-pixel ring.
    return out_flat.reshape(N, C, hp, wp)[:, :, 1:H + 1, 1:W + 1]


@jax.jit
def residual_block_forward(params, x_nchw):
    return residual_block_pallas(params, x_nchw)


# --------------------------------------------------------------------------
# Parameter init (BN folded into scale/bias) and pure-JAX reference
# --------------------------------------------------------------------------
def _init_conv_bn(key, cin, cout):
    kw, kg, kb, km, kv = jax.random.split(key, 5)
    w = jax.random.normal(kw, (3, 3, cin, cout), jnp.float32) * 0.3   # HWIO
    gamma = jax.random.uniform(kg, (cout,), jnp.float32, 0.5, 1.5)
    beta = jax.random.normal(kb, (cout,), jnp.float32) * 0.1
    r_mean = jax.random.normal(km, (cout,), jnp.float32) * 0.1
    r_var = jax.random.uniform(kv, (cout,), jnp.float32, 0.5, 1.5)
    scale = gamma / jnp.sqrt(r_var + _BN_EPS)          # fold BN into scale/bias
    bias = beta - r_mean * scale
    return w, scale, bias


def init_residual_block_params(key, in_channels, intermediate_channels):
    k1, k2, k3 = jax.random.split(key, 3)
    w1, s1, b1 = _init_conv_bn(k1, in_channels, intermediate_channels)
    w2, s2, b2 = _init_conv_bn(k2, intermediate_channels, intermediate_channels)
    w3, s3, b3 = _init_conv_bn(k3, intermediate_channels, in_channels)
    return dict(w1=w1, s1=s1, b1=b1, w2=w2, s2=s2, b2=b2, w3=w3, s3=s3, b3=b3)


def _ref_forward(params, x_nchw):
    def conv(x, w):
        return jax.lax.conv_general_dilated(
            x, w, window_strides=(1, 1), padding="SAME",
            dimension_numbers=("NHWC", "HWIO", "NHWC"))

    x = jnp.transpose(x_nchw, (0, 2, 3, 1))
    ident = x
    h = jax.nn.relu(conv(x, params["w1"]) * params["s1"] + params["b1"])
    h = jax.nn.relu(conv(h, params["w2"]) * params["s2"] + params["b2"])
    o = jax.nn.relu(conv(h, params["w3"]) * params["s3"] + params["b3"] + ident)
    return jnp.transpose(o, (0, 3, 1, 2))


if __name__ == "__main__":
    key = jax.random.PRNGKey(0)
    k_param, k_x = jax.random.split(key)

    in_channels, intermediate_channels = 4, 8
    N, H, W = 2, 16, 16

    params = init_residual_block_params(k_param, in_channels, intermediate_channels)
    x = jax.random.normal(k_x, (N, in_channels, H, W), jnp.float32)   # NCHW, like PyTorch

    out = residual_block_forward(params, x)
    out = jax.block_until_ready(out)
    assert out.shape == (N, in_channels, H, W)

    ref = jax.block_until_ready(_ref_forward(params, x))
    # bf16 MXU operands -> slightly looser tolerance than pure-f32.
    assert jnp.allclose(out, ref, rtol=5e-2, atol=5e-2), "mismatch vs reference"

    print("KERNEL_OK")
</pallas_src>

<mosaic_0001>
module attributes {stable_mosaic.version = 11 : i64} {
  func.func @_fused_resblock_kernel(%arg0: i32, %arg1: memref<1x4x512xf32, #tpu.memory_space<vmem>>, %arg2: memref<9x8x4xbf16, #tpu.memory_space<vmem>>, %arg3: memref<8x1xf32, #tpu.memory_space<vmem>>, %arg4: memref<8x1xf32, #tpu.memory_space<vmem>>, %arg5: memref<9x8x8xbf16, #tpu.memory_space<vmem>>, %arg6: memref<8x1xf32, #tpu.memory_space<vmem>>, %arg7: memref<8x1xf32, #tpu.memory_space<vmem>>, %arg8: memref<9x4x8xbf16, #tpu.memory_space<vmem>>, %arg9: memref<4x1xf32, #tpu.memory_space<vmem>>, %arg10: memref<4x1xf32, #tpu.memory_space<vmem>>, %arg11: memref<1x324xf32, #tpu.memory_space<vmem>>, %arg12: memref<1x4x324xf32, #tpu.memory_space<vmem>>, %arg13: memref<8x512xf32, #tpu.memory_space<vmem>>, %arg14: memref<8x512xf32, #tpu.memory_space<vmem>>) attributes {dimension_semantics = [#tpu.dimension_semantics<parallel>], iteration_bounds = array<i64: 2>, scalar_prefetch = 0 : i64, scratch_operands = 2 : i64, tpu.core_type = #tpu.core_type<tc>, window_params = [{transform_indices = @transform_0, window_bounds = array<i64: 1, 4, 512>}, {pipeline_mode = #tpu.pipeline_mode<synchronous>, transform_indices = @transform_1, window_bounds = array<i64: 9, 8, 4>}, {pipeline_mode = #tpu.pipeline_mode<synchronous>, transform_indices = @transform_2, window_bounds = array<i64: 8, 1>}, {pipeline_mode = #tpu.pipeline_mode<synchronous>, transform_indices = @transform_3, window_bounds = array<i64: 8, 1>}, {pipeline_mode = #tpu.pipeline_mode<synchronous>, transform_indices = @transform_4, window_bounds = array<i64: 9, 8, 8>}, {pipeline_mode = #tpu.pipeline_mode<synchronous>, transform_indices = @transform_5, window_bounds = array<i64: 8, 1>}, {pipeline_mode = #tpu.pipeline_mode<synchronous>, transform_indices = @transform_6, window_bounds = array<i64: 8, 1>}, {pipeline_mode = #tpu.pipeline_mode<synchronous>, transform_indices = @transform_7, window_bounds = array<i64: 9, 4, 8>}, {pipeline_mode = #tpu.pipeline_mode<synchronous>, transform_indices = @transform_8, window_bounds = array<i64: 4, 1>}, {pipeline_mode = #tpu.pipeline_mode<synchronous>, transform_indices = @transform_9, window_bounds = array<i64: 4, 1>}, {pipeline_mode = #tpu.pipeline_mode<synchronous>, transform_indices = @transform_10, window_bounds = array<i64: 1, 324>}, {transform_indices = @transform_11, window_bounds = array<i64: 1, 4, 324>}]} {
    %c0 = arith.constant 0 : index
    %c0_0 = arith.constant 0 : index
    %0 = vector.load %arg11[%c0, %c0_0] : memref<1x324xf32, #tpu.memory_space<vmem>>, vector<1x324xf32>
    %cst = arith.constant 0.000000e+00 : f32
    %1 = vector.broadcast %cst : f32 to vector<8x512xf32>
    %c0_1 = arith.constant 0 : index
    %c0_2 = arith.constant 0 : index
    %2 = vector.load %arg13[%c0_1, %c0_2] : memref<8x512xf32, #tpu.memory_space<vmem>>, vector<8x512xf32>
    tpu.vector_store %arg13[%c0_1, %c0_2], %1 {strides = array<i32>} : memref<8x512xf32, #tpu.memory_space<vmem>>, vector<8x512xf32>,
    %c0_3 = arith.constant 0 : index
    %c0_4 = arith.constant 0 : index
    %c109 = arith.constant 109 : index
    %3 = vector.load %arg1[%c0_3, %c0_4, %c109] : memref<1x4x512xf32, #tpu.memory_space<vmem>>, vector<1x4x324xf32>
    %4 = vector.shape_cast %3 : vector<1x4x324xf32> to vector<4x324xf32>
    %5 = arith.truncf %4 : vector<4x324xf32> to vector<4x324xbf16>
    %c0_5 = arith.constant 0 : index
    %c0_6 = arith.constant 0 : index
    %c0_7 = arith.constant 0 : index
    %6 = vector.load %arg2[%c0_5, %c0_6, %c0_7] : memref<9x8x4xbf16, #tpu.memory_space<vmem>>, vector<1x8x4xbf16>
    %7 = vector.shape_cast %6 : vector<1x8x4xbf16> to vector<8x4xbf16>
    %cst_8 = arith.constant dense<0.000000e+00> : vector<8x324xf32>
    %8 = tpu.matmul %7, %5, %cst_8 {dimension_numbers = #tpu.dot_dimension_numbers<[1], [0], [0], [1], [0, 0, 1, 1], [], []>} : vector<8x4xbf16>, vector<4x324xbf16>, vector<8x324xf32> -> vector<8x324xf32>
    %c0_9 = arith.constant 0 : index
    %c0_10 = arith.constant 0 : index
    %c110 = arith.constant 110 : index
    %9 = vector.load %arg1[%c0_9, %c0_10, %c110] : memref<1x4x512xf32, #tpu.memory_space<vmem>>, vector<1x4x324xf32>
    %10 = vector.shape_cast %9 : vector<1x4x324xf32> to vector<4x324xf32>
    %11 = arith.truncf %10 : vector<4x324xf32> to vector<4x324xbf16>
    %c1 = arith.constant 1 : index
    %c0_11 = arith.constant 0 : index
    %c0_12 = arith.constant 0 : index
    %12 = vector.load %arg2[%c1, %c0_11, %c0_12] : memref<9x8x4xbf16, #tpu.memory_space<vmem>>, vector<1x8x4xbf16>
    %13 = vector.shape_cast %12 : vector<1x8x4xbf16> to vector<8x4xbf16>
    %cst_13 = arith.constant dense<0.000000e+00> : vector<8x324xf32>
    %14 = tpu.matmul %13, %11, %cst_13 {dimension_numbers = #tpu.dot_dimension_numbers<[1], [0], [0], [1], [0, 0, 1, 1], [], []>} : vector<8x4xbf16>, vector<4x324xbf16>, vector<8x324xf32> -> vector<8x324xf32>
    %15 = arith.addf %8, %14 : vector<8x324xf32>
    %c0_14 = arith.constant 0 : index
    %c0_15 = arith.constant 0 : index
    %c111 = arith.constant 111 : index
    %16 = vector.load %arg1[%c0_14, %c0_15, %c111] : memref<1x4x512xf32, #tpu.memory_space<vmem>>, vector<1x4x324xf32>
    %17 = vector.shape_cast %16 : vector<1x4x324xf32> to vector<4x324xf32>
    %18 = arith.truncf %17 : vector<4x324xf32> to vector<4x324xbf16>
    %c2 = arith.constant 2 : index
    %c0_16 = arith.constant 0 : index
    %c0_17 = arith.constant 0 : index
    %19 = vector.load %arg2[%c2, %c0_16, %c0_17] : memref<9x8x4xbf16, #tpu.memory_space<vmem>>, vector<1x8x4xbf16>
    %20 = vector.shape_cast %19 : vector<1x8x4xbf16> to vector<8x4xbf16>
    %cst_18 = arith.constant dense<0.000000e+00> : vector<8x324xf32>
    %21 = tpu.matmul %20, %18, %cst_18 {dimension_numbers = #tpu.dot_dimension_numbers<[1], [0], [0], [1], [0, 0, 1, 1], [], []>} : vector<8x4xbf16>, vector<4x324xbf16>, vector<8x324xf32> -> vector<8x324xf32>
    %22 = arith.addf %15, %21 : vector<8x324xf32>
    %c0_19 = arith.constant 0 : index
    %c0_20 = arith.constant 0 : index
    %c127 = arith.constant 127 : index
    %23 = vector.load %arg1[%c0_19, %c0_20, %c127] : memref<1x4x512xf32, #tpu.memory_space<vmem>>, vector<1x4x324xf32>
    %24 = vector.shape_cast %23 : vector<1x4x324xf32> to vector<4x324xf32>
    %25 = arith.truncf %24 : vector<4x324xf32> to vector<4x324xbf16>
    %c3 = arith.constant 3 : index
    %c0_21 = arith.constant 0 : index
    %c0_22 = arith.constant 0 : index
    %26 = vector.load %arg2[%c3, %c0_21, %c0_22] : memref<9x8x4xbf16, #tpu.memory_space<vmem>>, vector<1x8x4xbf16>
    %27 = vector.shape_cast %26 : vector<1x8x4xbf16> to vector<8x4xbf16>
    %cst_23 = arith.constant dense<0.000000e+00> : vector<8x324xf32>
    %28 = tpu.matmul %27, %25, %cst_23 {dimension_numbers = #tpu.dot_dimension_numbers<[1], [0], [0], [1], [0, 0, 1, 1], [], []>} : vector<8x4xbf16>, vector<4x324xbf16>, vector<8x324xf32> -> vector<8x324xf32>
    %29 = arith.addf %22, %28 : vector<8x324xf32>
    %c0_24 = arith.constant 0 : index
    %c0_25 = arith.constant 0 : index
    %c128 = arith.constant 128 : index
    %30 = vector.load %arg1[%c0_24, %c0_25, %c128] : memref<1x4x512xf32, #tpu.memory_space<vmem>>, vector<1x4x324xf32>
    %31 = vector.shape_cast %30 : vector<1x4x324xf32> to vector<4x324xf32>
    %32 = arith.truncf %31 : vector<4x324xf32> to vector<4x324xbf16>
    %c4 = arith.constant 4 : index
    %c0_26 = arith.constant 0 : index
    %c0_27 = arith.constant 0 : index
    %33 = vector.load %arg2[%c4, %c0_26, %c0_27] : memref<9x8x4xbf16, #tpu.memory_space<vmem>>, vector<1x8x4xbf16>
    %34 = vector.shape_cast %33 : vector<1x8x4xbf16> to vector<8x4xbf16>
    %cst_28 = arith.constant dense<0.000000e+00> : vector<8x324xf32>
    %35 = tpu.matmul %34, %32, %cst_28 {dimension_numbers = #tpu.dot_dimension_numbers<[1], [0], [0], [1], [0, 0, 1, 1], [], []>} : vector<8x4xbf16>, vector<4x324xbf16>, vector<8x324xf32> -> vector<8x324xf32>
    %36 = arith.addf %29, %35 : vector<8x324xf32>
    %c0_29 = arith.constant 0 : index
    %c0_30 = arith.constant 0 : index
    %c129 = arith.constant 129 : index
    %37 = vector.load %arg1[%c0_29, %c0_30, %c129] : memref<1x4x512xf32, #tpu.memory_space<vmem>>, vector<1x4x324xf32>
    %38 = vector.shape_cast %37 : vector<1x4x324xf32> to vector<4x324xf32>
    %39 = arith.truncf %38 : vector<4x324xf32> to vector<4x324xbf16>
    %c5 = arith.constant 5 : index
    %c0_31 = arith.constant 0 : index
    %c0_32 = arith.constant 0 : index
    %40 = vector.load %arg2[%c5, %c0_31, %c0_32] : memref<9x8x4xbf16, #tpu.memory_space<vmem>>, vector<1x8x4xbf16>
    %41 = vector.shape_cast %40 : vector<1x8x4xbf16> to vector<8x4xbf16>
    %cst_33 = arith.constant dense<0.000000e+00> : vector<8x324xf32>
    %42 = tpu.matmul %41, %39, %cst_33 {dimension_numbers = #tpu.dot_dimension_numbers<[1], [0], [0], [1], [0, 0, 1, 1], [], []>} : vector<8x4xbf16>, vector<4x324xbf16>, vector<8x324xf32> -> vector<8x324xf32>
    %43 = arith.addf %36, %42 : vector<8x324xf32>
    %c0_34 = arith.constant 0 : index
    %c0_35 = arith.constant 0 : index
    %c145 = arith.constant 145 : index
    %44 = vector.load %arg1[%c0_34, %c0_35, %c145] : memref<1x4x512xf32, #tpu.memory_space<vmem>>, vector<1x4x324xf32>
    %45 = vector.shape_cast %44 : vector<1x4x324xf32> to vector<4x324xf32>
    %46 = arith.truncf %45 : vector<4x324xf32> to vector<4x324xbf16>
    %c6 = arith.constant 6 : index
    %c0_36 = arith.constant 0 : index
    %c0_37 = arith.constant 0 : index
    %47 = vector.load %arg2[%c6, %c0_36, %c0_37] : memref<9x8x4xbf16, #tpu.memory_space<vmem>>, vector<1x8x4xbf16>
    %48 = vector.shape_cast %47 : vector<1x8x4xbf16> to vector<8x4xbf16>
    %cst_38 = arith.constant dense<0.000000e+00> : vector<8x324xf32>
    %49 = tpu.matmul %48, %46, %cst_38 {dimension_numbers = #tpu.dot_dimension_numbers<[1], [0], [0], [1], [0, 0, 1, 1], [], []>} : vector<8x4xbf16>, vector<4x324xbf16>, vector<8x324xf32> -> vector<8x324xf32>
    %50 = arith.addf %43, %49 : vector<8x324xf32>
    %c0_39 = arith.constant 0 : index
    %c0_40 = arith.constant 0 : index
    %c146 = arith.constant 146 : index
    %51 = vector.load %arg1[%c0_39, %c0_40, %c146] : memref<1x4x512xf32, #tpu.memory_space<vmem>>, vector<1x4x324xf32>
    %52 = vector.shape_cast %51 : vector<1x4x324xf32> to vector<4x324xf32>
    %53 = arith.truncf %52 : vector<4x324xf32> to vector<4x324xbf16>
    %c7 = arith.constant 7 : index
    %c0_41 = arith.constant 0 : index
    %c0_42 = arith.constant 0 : index
    %54 = vector.load %arg2[%c7, %c0_41, %c0_42] : memref<9x8x4xbf16, #tpu.memory_space<vmem>>, vector<1x8x4xbf16>
    %55 = vector.shape_cast %54 : vector<1x8x4xbf16> to vector<8x4xbf16>
    %cst_43 = arith.constant dense<0.000000e+00> : vector<8x324xf32>
    %56 = tpu.matmul %55, %53, %cst_43 {dimension_numbers = #tpu.dot_dimension_numbers<[1], [0], [0], [1], [0, 0, 1, 1], [], []>} : vector<8x4xbf16>, vector<4x324xbf16>, vector<8x324xf32> -> vector<8x324xf32>
    %57 = arith.addf %50, %56 : vector<8x324xf32>
    %c0_44 = arith.constant 0 : index
    %c0_45 = arith.constant 0 : index
    %c147 = arith.constant 147 : index
    %58 = vector.load %arg1[%c0_44, %c0_45, %c147] : memref<1x4x512xf32, #tpu.memory_space<vmem>>, vector<1x4x324xf32>
    %59 = vector.shape_cast %58 : vector<1x4x324xf32> to vector<4x324xf32>
    %60 = arith.truncf %59 : vector<4x324xf32> to vector<4x324xbf16>
    %c8 = arith.constant 8 : index
    %c0_46 = arith.constant 0 : index
    %c0_47 = arith.constant 0 : index
    %61 = vector.load %arg2[%c8, %c0_46, %c0_47] : memref<9x8x4xbf16, #tpu.memory_space<vmem>>, vector<1x8x4xbf16>
    %62 = vector.shape_cast %61 : vector<1x8x4xbf16> to vector<8x4xbf16>
    %cst_48 = arith.constant dense<0.000000e+00> : vector<8x324xf32>
    %63 = tpu.matmul %62, %60, %cst_48 {dimension_numbers = #tpu.dot_dimension_numbers<[1], [0], [0], [1], [0, 0, 1, 1], [], []>} : vector<8x4xbf16>, vector<4x324xbf16>, vector<8x324xf32> -> vector<8x324xf32>
    %64 = arith.addf %57, %63 : vector<8x324xf32>
    %c0_49 = arith.constant 0 : index
    %c0_50 = arith.constant 0 : index
    %65 = vector.load %arg3[%c0_49, %c0_50] : memref<8x1xf32, #tpu.memory_space<vmem>>, vector<8x1xf32>
    %66 = vector.broadcast %65 : vector<8x1xf32> to vector<8x324xf32>
    %67 = arith.mulf %64, %66 : vector<8x324xf32>
    %c0_51 = arith.constant 0 : index
    %c0_52 = arith.constant 0 : index
    %68 = vector.load %arg4[%c0_51, %c0_52] : memref<8x1xf32, #tpu.memory_space<vmem>>, vector<8x1xf32>
    %69 = vector.broadcast %68 : vector<8x1xf32> to vector<8x324xf32>
    %70 = arith.addf %67, %69 : vector<8x324xf32>
    %cst_53 = arith.constant 0.000000e+00 : f32
    %71 = vector.broadcast %cst_53 : f32 to vector<8x324xf32>
    %72 = arith.maximumf %70, %71 : vector<8x324xf32>
    %73 = vector.broadcast %0 : vector<1x324xf32> to vector<8x324xf32>
    %74 = arith.mulf %72, %73 : vector<8x324xf32>
    %c0_54 = arith.constant 0 : index
    %c128_55 = arith.constant 128 : index
    %75 = vector.load %arg13[%c0_54, %c128_55] : memref<8x512xf32, #tpu.memory_space<vmem>>, vector<8x324xf32>
    tpu.vector_store %arg13[%c0_54, %c128_55], %74 {strides = array<i32>} : memref<8x512xf32, #tpu.memory_space<vmem>>, vector<8x324xf32>,
    %cst_56 = arith.constant 0.000000e+00 : f32
    %76 = vector.broadcast %cst_56 : f32 to vector<8x512xf32>
    %c0_57 = arith.constant 0 : index
    %c0_58 = arith.constant 0 : index
    %77 = vector.load %arg14[%c0_57, %c0_58] : memref<8x512xf32, #tpu.memory_space<vmem>>, vector<8x512xf32>
    tpu.vector_store %arg14[%c0_57, %c0_58], %76 {strides = array<i32>} : memref<8x512xf32, #tpu.memory_space<vmem>>, vector<8x512xf32>,
    %c0_59 = arith.constant 0 : index
    %c109_60 = arith.constant 109 : index
    %78 = vector.load %arg13[%c0_59, %c109_60] : memref<8x512xf32, #tpu.memory_space<vmem>>, vector<8x324xf32>
    %79 = arith.truncf %78 : vector<8x324xf32> to vector<8x324xbf16>
    %c0_61 = arith.constant 0 : index
    %c0_62 = arith.constant 0 : index
    %c0_63 = arith.constant 0 : index
    %80 = vector.load %arg5[%c0_61, %c0_62, %c0_63] : memref<9x8x8xbf16, #tpu.memory_space<vmem>>, vector<1x8x8xbf16>
    %81 = vector.shape_cast %80 : vector<1x8x8xbf16> to vector<8x8xbf16>
    %cst_64 = arith.constant dense<0.000000e+00> : vector<8x324xf32>
    %82 = tpu.matmul %81, %79, %cst_64 {dimension_numbers = #tpu.dot_dimension_numbers<[1], [0], [0], [1], [0, 0, 1, 1], [], []>} : vector<8x8xbf16>, vector<8x324xbf16>, vector<8x324xf32> -> vector<8x324xf32>
    %c0_65 = arith.constant 0 : index
    %c110_66 = arith.constant 110 : index
    %83 = vector.load %arg13[%c0_65, %c110_66] : memref<8x512xf32, #tpu.memory_space<vmem>>, vector<8x324xf32>
    %84 = arith.truncf %83 : vector<8x324xf32> to vector<8x324xbf16>
    %c1_67 = arith.constant 1 : index
    %c0_68 = arith.constant 0 : index
    %c0_69 = arith.constant 0 : index
    %85 = vector.load %arg5[%c1_67, %c0_68, %c0_69] : memref<9x8x8xbf16, #tpu.memory_space<vmem>>, vector<1x8x8xbf16>
    %86 = vector.shape_cast %85 : vector<1x8x8xbf16> to vector<8x8xbf16>
    %cst_70 = arith.constant dense<0.000000e+00> : vector<8x324xf32>
    %87 = tpu.matmul %86, %84, %cst_70 {dimension_numbers = #tpu.dot_dimension_numbers<[1], [0], [0], [1], [0, 0, 1, 1], [], []>} : vector<8x8xbf16>, vector<8x324xbf16>, vector<8x324xf32> -> vector<8x324xf32>
    %88 = arith.addf %82, %87 : vector<8x324xf32>
    %c0_71 = arith.constant 0 : index
    %c111_72 = arith.constant 111 : index
    %89 = vector.load %arg13[%c0_71, %c111_72] : memref<8x512xf32, #tpu.memory_space<vmem>>, vector<8x324xf32>
    %90 = arith.truncf %89 : vector<8x324xf32> to vector<8x324xbf16>
    %c2_73 = arith.constant 2 : index
    %c0_74 = arith.constant 0 : index
    %c0_75 = arith.constant 0 : index
    %91 = vector.load %arg5[%c2_73, %c0_74, %c0_75] : memref<9x8x8xbf16, #tpu.memory_space<vmem>>, vector<1x8x8xbf16>
    %92 = vector.shape_cast %91 : vector<1x8x8xbf16> to vector<8x8xbf16>
    %cst_76 = arith.constant dense<0.000000e+00> : vector<8x324xf32>
    %93 = tpu.matmul %92, %90, %cst_76 {dimension_numbers = #tpu.dot_dimension_numbers<[1], [0], [0], [1], [0, 0, 1, 1], [], []>} : vector<8x8xbf16>, vector<8x324xbf16>, vector<8x324xf32> -> vector<8x324xf32>
    %94 = arith.addf %88, %93 : vector<8x324xf32>
    %c0_77 = arith.constant 0 : index
    %c127_78 = arith.constant 127 : index
    %95 = vector.load %arg13[%c0_77, %c127_78] : memref<8x512xf32, #tpu.memory_space<vmem>>, vector<8x324xf32>
    %96 = arith.truncf %95 : vector<8x324xf32> to vector<8x324xbf16>
    %c3_79 = arith.constant 3 : index
    %c0_80 = arith.constant 0 : index
    %c0_81 = arith.constant 0 : index
    %97 = vector.load %arg5[%c3_79, %c0_80, %c0_81] : memref<9x8x8xbf16, #tpu.memory_space<vmem>>, vector<1x8x8xbf16>
    %98 = vector.shape_cast %97 : vector<1x8x8xbf16> to vector<8x8xbf16>
    %cst_82 = arith.constant dense<0.000000e+00> : vector<8x324xf32>
    %99 = tpu.matmul %98, %96, %cst_82 {dimension_numbers = #tpu.dot_dimension_numbers<[1], [0], [0], [1], [0, 0, 1, 1], [], []>} : vector<8x8xbf16>, vector<8x324xbf16>, vector<8x324xf32> -> vector<8x324xf32>
    %100 = arith.addf %94, %99 : vector<8x324xf32>
    %c0_83 = arith.constant 0 : index
    %c128_84 = arith.constant 128 : index
    %101 = vector.load %arg13[%c0_83, %c128_84] : memref<8x512xf32, #tpu.memory_space<vmem>>, vector<8x324xf32>
    %102 = arith.truncf %101 : vector<8x324xf32> to vector<8x324xbf16>
    %c4_85 = arith.constant 4 : index
    %c0_86 = arith.constant 0 : index
    %c0_87 = arith.constant 0 : index
    %103 = vector.load %arg5[%c4_85, %c0_86, %c0_87] : memref<9x8x8xbf16, #tpu.memory_space<vmem>>, vector<1x8x8xbf16>
    %104 = vector.shape_cast %103 : vector<1x8x8xbf16> to vector<8x8xbf16>
    %cst_88 = arith.constant dense<0.000000e+00> : vector<8x324xf32>
    %105 = tpu.matmul %104, %102, %cst_88 {dimension_numbers = #tpu.dot_dimension_numbers<[1], [0], [0], [1], [0, 0, 1, 1], [], []>} : vector<8x8xbf16>, vector<8x324xbf16>, vector<8x324xf32> -> vector<8x324xf32>
    %106 = arith.addf %100, %105 : vector<8x324xf32>
    %c0_89 = arith.constant 0 : index
    %c129_90 = arith.constant 129 : index
    %107 = vector.load %arg13[%c0_89, %c129_90] : memref<8x512xf32, #tpu.memory_space<vmem>>, vector<8x324xf32>
    %108 = arith.truncf %107 : vector<8x324xf32> to vector<8x324xbf16>
    %c5_91 = arith.constant 5 : index
    %c0_92 = arith.constant 0 : index
    %c0_93 = arith.constant 0 : index
    %109 = vector.load %arg5[%c5_91, %c0_92, %c0_93] : memref<9x8x8xbf16, #tpu.memory_space<vmem>>, vector<1x8x8xbf16>
    %110 = vector.shape_cast %109 : vector<1x8x8xbf16> to vector<8x8xbf16>
    %cst_94 = arith.constant dense<0.000000e+00> : vector<8x324xf32>
    %111 = tpu.matmul %110, %108, %cst_94 {dimension_numbers = #tpu.dot_dimension_numbers<[1], [0], [0], [1], [0, 0, 1, 1], [], []>} : vector<8x8xbf16>, vector<8x324xbf16>, vector<8x324xf32> -> vector<8x324xf32>
    %112 = arith.addf %106, %111 : vector<8x324xf32>
    %c0_95 = arith.constant 0 : index
    %c145_96 = arith.constant 145 : index
    %113 = vector.load %arg13[%c0_95, %c145_96] : memref<8x512xf32, #tpu.memory_space<vmem>>, vector<8x324xf32>
    %114 = arith.truncf %113 : vector<8x324xf32> to vector<8x324xbf16>
    %c6_97 = arith.constant 6 : index
    %c0_98 = arith.constant 0 : index
    %c0_99 = arith.constant 0 : index
    %115 = vector.load %arg5[%c6_97, %c0_98, %c0_99] : memref<9x8x8xbf16, #tpu.memory_space<vmem>>, vector<1x8x8xbf16>
    %116 = vector.shape_cast %115 : vector<1x8x8xbf16> to vector<8x8xbf16>
    %cst_100 = arith.constant dense<0.000000e+00> : vector<8x324xf32>
    %117 = tpu.matmul %116, %114, %cst_100 {dimension_numbers = #tpu.dot_dimension_numbers<[1], [0], [0], [1], [0, 0, 1, 1], [], []>} : vector<8x8xbf16>, vector<8x324xbf16>, vector<8x324xf32> -> vector<8x324xf32>
    %118 = arith.addf %112, %117 : vector<8x324xf32>
    %c0_101 = arith.constant 0 : index
    %c146_102 = arith.constant 146 : index
    %119 = vector.load %arg13[%c0_101, %c146_102] : memref<8x512xf32, #tpu.memory_space<vmem>>, vector<8x324xf32>
    %120 = arith.truncf %119 : vector<8x324xf32> to vector<8x324xbf16>
    %c7_103 = arith.constant 7 : index
    %c0_104 = arith.constant 0 : index
    %c0_105 = arith.constant 0 : index
    %121 = vector.load %arg5[%c7_103, %c0_104, %c0_105] : memref<9x8x8xbf16, #tpu.memory_space<vmem>>, vector<1x8x8xbf16>
    %122 = vector.shape_cast %121 : vector<1x8x8xbf16> to vector<8x8xbf16>
    %cst_106 = arith.constant dense<0.000000e+00> : vector<8x324xf32>
    %123 = tpu.matmul %122, %120, %cst_106 {dimension_numbers = #tpu.dot_dimension_numbers<[1], [0], [0], [1], [0, 0, 1, 1], [], []>} : vector<8x8xbf16>, vector<8x324xbf16>, vector<8x324xf32> -> vector<8x324xf32>
    %124 = arith.addf %118, %123 : vector<8x324xf32>
    %c0_107 = arith.constant 0 : index
    %c147_108 = arith.constant 147 : index
    %125 = vector.load %arg13[%c0_107, %c147_108] : memref<8x512xf32, #tpu.memory_space<vmem>>, vector<8x324xf32>
    %126 = arith.truncf %125 : vector<8x324xf32> to vector<8x324xbf16>
    %c8_109 = arith.constant 8 : index
    %c0_110 = arith.constant 0 : index
    %c0_111 = arith.constant 0 : index
    %127 = vector.load %arg5[%c8_109, %c0_110, %c0_111] : memref<9x8x8xbf16, #tpu.memory_space<vmem>>, vector<1x8x8xbf16>
    %128 = vector.shape_cast %127 : vector<1x8x8xbf16> to vector<8x8xbf16>
    %cst_112 = arith.constant dense<0.000000e+00> : vector<8x324xf32>
    %129 = tpu.matmul %128, %126, %cst_112 {dimension_numbers = #tpu.dot_dimension_numbers<[1], [0], [0], [1], [0, 0, 1, 1], [], []>} : vector<8x8xbf16>, vector<8x324xbf16>, vector<8x324xf32> -> vector<8x324xf32>
    %130 = arith.addf %124, %129 : vector<8x324xf32>
    %c0_113 = arith.constant 0 : index
    %c0_114 = arith.constant 0 : index
    %131 = vector.load %arg6[%c0_113, %c0_114] : memref<8x1xf32, #tpu.memory_space<vmem>>, vector<8x1xf32>
    %132 = vector.broadcast %131 : vector<8x1xf32> to vector<8x324xf32>
    %133 = arith.mulf %130, %132 : vector<8x324xf32>
    %c0_115 = arith.constant 0 : index
    %c0_116 = arith.constant 0 : index
    %134 = vector.load %arg7[%c0_115, %c0_116] : memref<8x1xf32, #tpu.memory_space<vmem>>, vector<8x1xf32>
    %135 = vector.broadcast %134 : vector<8x1xf32> to vector<8x324xf32>
    %136 = arith.addf %133, %135 : vector<8x324xf32>
    %cst_117 = arith.constant 0.000000e+00 : f32
    %137 = vector.broadcast %cst_117 : f32 to vector<8x324xf32>
    %138 = arith.maximumf %136, %137 : vector<8x324xf32>
    %139 = vector.broadcast %0 : vector<1x324xf32> to vector<8x324xf32>
    %140 = arith.mulf %138, %139 : vector<8x324xf32>
    %c0_118 = arith.constant 0 : index
    %c128_119 = arith.constant 128 : index
    %141 = vector.load %arg14[%c0_118, %c128_119] : memref<8x512xf32, #tpu.memory_space<vmem>>, vector<8x324xf32>
    tpu.vector_store %arg14[%c0_118, %c128_119], %140 {strides = array<i32>} : memref<8x512xf32, #tpu.memory_space<vmem>>, vector<8x324xf32>,
    %c0_120 = arith.constant 0 : index
    %c0_121 = arith.constant 0 : index
    %c128_122 = arith.constant 128 : index
    %142 = vector.load %arg1[%c0_120, %c0_121, %c128_122] : memref<1x4x512xf32, #tpu.memory_space<vmem>>, vector<1x4x324xf32>
    %143 = vector.shape_cast %142 : vector<1x4x324xf32> to vector<4x324xf32>
    %c0_123 = arith.constant 0 : index
    %c109_124 = arith.constant 109 : index
    %144 = vector.load %arg14[%c0_123, %c109_124] : memref<8x512xf32, #tpu.memory_space<vmem>>, vector<8x324xf32>
    %145 = arith.truncf %144 : vector<8x324xf32> to vector<8x324xbf16>
    %c0_125 = arith.constant 0 : index
    %c0_126 = arith.constant 0 : index
    %c0_127 = arith.constant 0 : index
    %146 = vector.load %arg8[%c0_125, %c0_126, %c0_127] : memref<9x4x8xbf16, #tpu.memory_space<vmem>>, vector<1x4x8xbf16>
    %147 = vector.shape_cast %146 : vector<1x4x8xbf16> to vector<4x8xbf16>
    %cst_128 = arith.constant dense<0.000000e+00> : vector<4x324xf32>
    %148 = tpu.matmul %147, %145, %cst_128 {dimension_numbers = #tpu.dot_dimension_numbers<[1], [0], [0], [1], [0, 0, 1, 1], [], []>} : vector<4x8xbf16>, vector<8x324xbf16>, vector<4x324xf32> -> vector<4x324xf32>
    %c0_129 = arith.constant 0 : index
    %c110_130 = arith.constant 110 : index
    %149 = vector.load %arg14[%c0_129, %c110_130] : memref<8x512xf32, #tpu.memory_space<vmem>>, vector<8x324xf32>
    %150 = arith.truncf %149 : vector<8x324xf32> to vector<8x324xbf16>
    %c1_131 = arith.constant 1 : index
    %c0_132 = arith.constant 0 : index
    %c0_133 = arith.constant 0 : index
    %151 = vector.load %arg8[%c1_131, %c0_132, %c0_133] : memref<9x4x8xbf16, #tpu.memory_space<vmem>>, vector<1x4x8xbf16>
    %152 = vector.shape_cast %151 : vector<1x4x8xbf16> to vector<4x8xbf16>
    %cst_134 = arith.constant dense<0.000000e+00> : vector<4x324xf32>
    %153 = tpu.matmul %152, %150, %cst_134 {dimension_numbers = #tpu.dot_dimension_numbers<[1], [0], [0], [1], [0, 0, 1, 1], [], []>} : vector<4x8xbf16>, vector<8x324xbf16>, vector<4x324xf32> -> vector<4x324xf32>
    %154 = arith.addf %148, %153 : vector<4x324xf32>
    %c0_135 = arith.constant 0 : index
    %c111_136 = arith.constant 111 : index
    %155 = vector.load %arg14[%c0_135, %c111_136] : memref<8x512xf32, #tpu.memory_space<vmem>>, vector<8x324xf32>
    %156 = arith.truncf %155 : vector<8x324xf32> to vector<8x324xbf16>
    %c2_137 = arith.constant 2 : index
    %c0_138 = arith.constant 0 : index
    %c0_139 = arith.constant 0 : index
    %157 = vector.load %arg8[%c2_137, %c0_138, %c0_139] : memref<9x4x8xbf16, #tpu.memory_space<vmem>>, vector<1x4x8xbf16>
    %158 = vector.shape_cast %157 : vector<1x4x8xbf16> to vector<4x8xbf16>
    %cst_140 = arith.constant dense<0.000000e+00> : vector<4x324xf32>
    %159 = tpu.matmul %158, %156, %cst_140 {dimension_numbers = #tpu.dot_dimension_numbers<[1], [0], [0], [1], [0, 0, 1, 1], [], []>} : vector<4x8xbf16>, vector<8x324xbf16>, vector<4x324xf32> -> vector<4x324xf32>
    %160 = arith.addf %154, %159 : vector<4x324xf32>
    %c0_141 = arith.constant 0 : index
    %c127_142 = arith.constant 127 : index
    %161 = vector.load %arg14[%c0_141, %c127_142] : memref<8x512xf32, #tpu.memory_space<vmem>>, vector<8x324xf32>
    %162 = arith.truncf %161 : vector<8x324xf32> to vector<8x324xbf16>
    %c3_143 = arith.constant 3 : index
    %c0_144 = arith.constant 0 : index
    %c0_145 = arith.constant 0 : index
    %163 = vector.load %arg8[%c3_143, %c0_144, %c0_145] : memref<9x4x8xbf16, #tpu.memory_space<vmem>>, vector<1x4x8xbf16>
    %164 = vector.shape_cast %163 : vector<1x4x8xbf16> to vector<4x8xbf16>
    %cst_146 = arith.constant dense<0.000000e+00> : vector<4x324xf32>
    %165 = tpu.matmul %164, %162, %cst_146 {dimension_numbers = #tpu.dot_dimension_numbers<[1], [0], [0], [1], [0, 0, 1, 1], [], []>} : vector<4x8xbf16>, vector<8x324xbf16>, vector<4x324xf32> -> vector<4x324xf32>
    %166 = arith.addf %160, %165 : vector<4x324xf32>
    %c0_147 = arith.constant 0 : index
    %c128_148 = arith.constant 128 : index
    %167 = vector.load %arg14[%c0_147, %c128_148] : memref<8x512xf32, #tpu.memory_space<vmem>>, vector<8x324xf32>
    %168 = arith.truncf %167 : vector<8x324xf32> to vector<8x324xbf16>
    %c4_149 = arith.constant 4 : index
    %c0_150 = arith.constant 0 : index
    %c0_151 = arith.constant 0 : index
    %169 = vector.load %arg8[%c4_149, %c0_150, %c0_151] : memref<9x4x8xbf16, #tpu.memory_space<vmem>>, vector<1x4x8xbf16>
    %170 = vector.shape_cast %169 : vector<1x4x8xbf16> to vector<4x8xbf16>
    %cst_152 = arith.constant dense<0.000000e+00> : vector<4x324xf32>
    %171 = tpu.matmul %170, %168, %cst_152 {dimension_numbers = #tpu.dot_dimension_numbers<[1], [0], [0], [1], [0, 0, 1, 1], [], []>} : vector<4x8xbf16>, vector<8x324xbf16>, vector<4x324xf32> -> vector<4x324xf32>
    %172 = arith.addf %166, %171 : vector<4x324xf32>
    %c0_153 = arith.constant 0 : index
    %c129_154 = arith.constant 129 : index
    %173 = vector.load %arg14[%c0_153, %c129_154] : memref<8x512xf32, #tpu.memory_space<vmem>>, vector<8x324xf32>
    %174 = arith.truncf %173 : vector<8x324xf32> to vector<8x324xbf16>
    %c5_155 = arith.constant 5 : index
    %c0_156 = arith.constant 0 : index
    %c0_157 = arith.constant 0 : index
    %175 = vector.load %arg8[%c5_155, %c0_156, %c0_157] : memref<9x4x8xbf16, #tpu.memory_space<vmem>>, vector<1x4x8xbf16>
    %176 = vector.shape_cast %175 : vector<1x4x8xbf16> to vector<4x8xbf16>
    %cst_158 = arith.constant dense<0.000000e+00> : vector<4x324xf32>
    %177 = tpu.matmul %176, %174, %cst_158 {dimension_numbers = #tpu.dot_dimension_numbers<[1], [0], [0], [1], [0, 0, 1, 1], [], []>} : vector<4x8xbf16>, vector<8x324xbf16>, vector<4x324xf32> -> vector<4x324xf32>
    %178 = arith.addf %172, %177 : vector<4x324xf32>
    %c0_159 = arith.constant 0 : index
    %c145_160 = arith.constant 145 : index
    %179 = vector.load %arg14[%c0_159, %c145_160] : memref<8x512xf32, #tpu.memory_space<vmem>>, vector<8x324xf32>
    %180 = arith.truncf %179 : vector<8x324xf32> to vector<8x324xbf16>
    %c6_161 = arith.constant 6 : index
    %c0_162 = arith.constant 0 : index
    %c0_163 = arith.constant 0 : index
    %181 = vector.load %arg8[%c6_161, %c0_162, %c0_163] : memref<9x4x8xbf16, #tpu.memory_space<vmem>>, vector<1x4x8xbf16>
    %182 = vector.shape_cast %181 : vector<1x4x8xbf16> to vector<4x8xbf16>
    %cst_164 = arith.constant dense<0.000000e+00> : vector<4x324xf32>
    %183 = tpu.matmul %182, %180, %cst_164 {dimension_numbers = #tpu.dot_dimension_numbers<[1], [0], [0], [1], [0, 0, 1, 1], [], []>} : vector<4x8xbf16>, vector<8x324xbf16>, vector<4x324xf32> -> vector<4x324xf32>
    %184 = arith.addf %178, %183 : vector<4x324xf32>
    %c0_165 = arith.constant 0 : index
    %c146_166 = arith.constant 146 : index
    %185 = vector.load %arg14[%c0_165, %c146_166] : memref<8x512xf32, #tpu.memory_space<vmem>>, vector<8x324xf32>
    %186 = arith.truncf %185 : vector<8x324xf32> to vector<8x324xbf16>
    %c7_167 = arith.constant 7 : index
    %c0_168 = arith.constant 0 : index
    %c0_169 = arith.constant 0 : index
    %187 = vector.load %arg8[%c7_167, %c0_168, %c0_169] : memref<9x4x8xbf16, #tpu.memory_space<vmem>>, vector<1x4x8xbf16>
    %188 = vector.shape_cast %187 : vector<1x4x8xbf16> to vector<4x8xbf16>
    %cst_170 = arith.constant dense<0.000000e+00> : vector<4x324xf32>
    %189 = tpu.matmul %188, %186, %cst_170 {dimension_numbers = #tpu.dot_dimension_numbers<[1], [0], [0], [1], [0, 0, 1, 1], [], []>} : vector<4x8xbf16>, vector<8x324xbf16>, vector<4x324xf32> -> vector<4x324xf32>
    %190 = arith.addf %184, %189 : vector<4x324xf32>
    %c0_171 = arith.constant 0 : index
    %c147_172 = arith.constant 147 : index
    %191 = vector.load %arg14[%c0_171, %c147_172] : memref<8x512xf32, #tpu.memory_space<vmem>>, vector<8x324xf32>
    %192 = arith.truncf %191 : vector<8x324xf32> to vector<8x324xbf16>
    %c8_173 = arith.constant 8 : index
    %c0_174 = arith.constant 0 : index
    %c0_175 = arith.constant 0 : index
    %193 = vector.load %arg8[%c8_173, %c0_174, %c0_175] : memref<9x4x8xbf16, #tpu.memory_space<vmem>>, vector<1x4x8xbf16>
    %194 = vector.shape_cast %193 : vector<1x4x8xbf16> to vector<4x8xbf16>
    %cst_176 = arith.constant dense<0.000000e+00> : vector<4x324xf32>
    %195 = tpu.matmul %194, %192, %cst_176 {dimension_numbers = #tpu.dot_dimension_numbers<[1], [0], [0], [1], [0, 0, 1, 1], [], []>} : vector<4x8xbf16>, vector<8x324xbf16>, vector<4x324xf32> -> vector<4x324xf32>
    %196 = arith.addf %190, %195 : vector<4x324xf32>
    %c0_177 = arith.constant 0 : index
    %c0_178 = arith.constant 0 : index
    %197 = vector.load %arg9[%c0_177, %c0_178] : memref<4x1xf32, #tpu.memory_space<vmem>>, vector<4x1xf32>
    %198 = vector.broadcast %197 : vector<4x1xf32> to vector<4x324xf32>
    %199 = arith.mulf %196, %198 : vector<4x324xf32>
    %c0_179 = arith.constant 0 : index
    %c0_180 = arith.constant 0 : index
    %200 = vector.load %arg10[%c0_179, %c0_180] : memref<4x1xf32, #tpu.memory_space<vmem>>, vector<4x1xf32>
    %201 = vector.broadcast %200 : vector<4x1xf32> to vector<4x324xf32>
    %202 = arith.addf %199, %201 : vector<4x324xf32>
    %203 = arith.addf %202, %143 : vector<4x324xf32>
    %cst_181 = arith.constant 0.000000e+00 : f32
    %204 = vector.broadcast %cst_181 : f32 to vector<4x324xf32>
    %205 = arith.maximumf %203, %204 : vector<4x324xf32>
    %c0_182 = arith.constant 0 : index
    %c0_183 = arith.constant 0 : index
    %c0_184 = arith.constant 0 : index
    %206 = vector.load %arg12[%c0_182, %c0_183, %c0_184] : memref<1x4x324xf32, #tpu.memory_space<vmem>>, vector<1x4x324xf32>
    %207 = vector.shape_cast %206 : vector<1x4x324xf32> to vector<4x324xf32>
    %208 = vector.shape_cast %205 : vector<4x324xf32> to vector<1x4x324xf32>
    tpu.vector_store %arg12[%c0_182, %c0_183, %c0_184], %208 {strides = array<i32>} : memref<1x4x324xf32, #tpu.memory_space<vmem>>, vector<1x4x324xf32>,
    return
  }
  func.func @transform_0(%arg0: i32) -> (i32, i32, i32) {
    %c0_i32 = arith.constant 0 : i32
    %c0_i32_0 = arith.constant 0 : i32
    %c0_i32_1 = arith.constant 0 : i32
    return %arg0, %c0_i32, %c0_i32_0 : i32, i32, i32
  }
  func.func @transform_1(%arg0: i32) -> (i32, i32, i32) {
    %c0_i32 = arith.constant 0 : i32
    %c0_i32_0 = arith.constant 0 : i32
    %c0_i32_1 = arith.constant 0 : i32
    %c0_i32_2 = arith.constant 0 : i32
    return %c0_i32, %c0_i32_0, %c0_i32_1 : i32, i32, i32
  }
  func.func @transform_2(%arg0: i32) -> (i32, i32) {
    %c0_i32 = arith.constant 0 : i32
    %c0_i32_0 = arith.constant 0 : i32
    %c0_i32_1 = arith.constant 0 : i32
    return %c0_i32, %c0_i32_0 : i32, i32
  }
  func.func @transform_3(%arg0: i32) -> (i32, i32) {
    %c0_i32 = arith.constant 0 : i32
    %c0_i32_0 = arith.constant 0 : i32
    %c0_i32_1 = arith.constant 0 : i32
    return %c0_i32, %c0_i32_0 : i32, i32
  }
  func.func @transform_4(%arg0: i32) -> (i32, i32, i32) {
    %c0_i32 = arith.constant 0 : i32
    %c0_i32_0 = arith.constant 0 : i32
    %c0_i32_1 = arith.constant 0 : i32
    %c0_i32_2 = arith.constant 0 : i32
    return %c0_i32, %c0_i32_0, %c0_i32_1 : i32, i32, i32
  }
  func.func @transform_5(%arg0: i32) -> (i32, i32) {
    %c0_i32 = arith.constant 0 : i32
    %c0_i32_0 = arith.constant 0 : i32
    %c0_i32_1 = arith.constant 0 : i32
    return %c0_i32, %c0_i32_0 : i32, i32
  }
  func.func @transform_6(%arg0: i32) -> (i32, i32) {
    %c0_i32 = arith.constant 0 : i32
    %c0_i32_0 = arith.constant 0 : i32
    %c0_i32_1 = arith.constant 0 : i32
    return %c0_i32, %c0_i32_0 : i32, i32
  }
  func.func @transform_7(%arg0: i32) -> (i32, i32, i32) {
    %c0_i32 = arith.constant 0 : i32
    %c0_i32_0 = arith.constant 0 : i32
    %c0_i32_1 = arith.constant 0 : i32
    %c0_i32_2 = arith.constant 0 : i32
    return %c0_i32, %c0_i32_0, %c0_i32_1 : i32, i32, i32
  }
  func.func @transform_8(%arg0: i32) -> (i32, i32) {
    %c0_i32 = arith.constant 0 : i32
    %c0_i32_0 = arith.constant 0 : i32
    %c0_i32_1 = arith.constant 0 : i32
    return %c0_i32, %c0_i32_0 : i32, i32
  }
  func.func @transform_9(%arg0: i32) -> (i32, i32) {
    %c0_i32 = arith.constant 0 : i32
    %c0_i32_0 = arith.constant 0 : i32
    %c0_i32_1 = arith.constant 0 : i32
    return %c0_i32, %c0_i32_0 : i32, i32
  }
  func.func @transform_10(%arg0: i32) -> (i32, i32) {
    %c0_i32 = arith.constant 0 : i32
    %c0_i32_0 = arith.constant 0 : i32
    %c0_i32_1 = arith.constant 0 : i32
    return %c0_i32, %c0_i32_0 : i32, i32
  }
  func.func @transform_11(%arg0: i32) -> (i32, i32, i32) {
    %c0_i32 = arith.constant 0 : i32
    %c0_i32_0 = arith.constant 0 : i32
    %c0_i32_1 = arith.constant 0 : i32
    return %arg0, %c0_i32, %c0_i32_0 : i32, i32, i32
  }
}

</mosaic_0001>

<bundles_post_ra>
// kernel: residual_block_forward.1
= control target key start
LH: loop header
LB: loop body
LE: loop exit
PB: predicated region body
PF: predicated region fallthrough
CT: control target
= control target key end

     0   :  { %s4179_s17 = smov 0   ;;  %s4810_s0 = inlined_call_operand.vmem [shape: f32[2,4,512], index: 0, kind: input, shape index: {}]   ;;  %s4811_s1 = inlined_call_operand.vmem [shape: bf16[9,8,4], index: 1, kind: input, shape index: {}]   ;;  %s4812_s2 = inlined_call_operand.vmem [shape: f32[8,1], index: 2, kind: input, shape index: {}]   ;;  %s4813_s3 = inlined_call_operand.vmem [shape: f32[8,1], index: 3, kind: input, shape index: {}]   ;;  %s4814_s4 = inlined_call_operand.vmem [shape: bf16[9,8,8], index: 4, kind: input, shape index: {}]   ;;  %s4815_s5 = inlined_call_operand.vmem [shape: f32[8,1], index: 5, kind: input, shape index: {}]   ;;  %s4816_s6 = inlined_call_operand.vmem [shape: f32[8,1], index: 6, kind: input, shape index: {}]   ;;  %s4817_s7 = inlined_call_operand.vmem [shape: bf16[9,4,8], index: 7, kind: input, shape index: {}]   ;;  %s4818_s8 = inlined_call_operand.vmem [shape: f32[4,1], index: 8, kind: input, shape index: {}]   ;;  %s4819_s9 = inlined_call_operand.vmem [shape: f32[4,1], index: 9, kind: input, shape index: {}]   ;;  %s4820_s10 = inlined_call_operand.vmem [shape: f32[1,324], index: 10, kind: input, shape index: {}]   ;;  %s4821_s11 = inlined_call_operand.vmem [shape: f32[2,4,324], index: 11, kind: output, shape index: {}]  }
   0x1 LB: > { %s3548_s18 = sadd.s32 4294967295, %s4105_s17   ;;  %p3552_p0 = scmp.ge.s32.totalorder %s4105_s17, 1  ;;  %s4105_s17 = sphi %s4179_s17, %s21_s17  }
   0x2   : > { %p337_p1 = scmp.lt.s32.totalorder %s4105_s17, 3 }
   0x4   : > { %p338_p2 = pnand %p3552_p0, %p337_p1 }
   0x5   : > { %p377_p3 = scmp.lt.s32.totalorder (!%p338_p2), %s3548_s18, 1  ;;  %v4107_v0 = vmov (!%p338_p2), 0.0   ;;  %v4108_v1 = vmov (!%p338_p2), 0   ;;  %vm4109_vm0 = vmmov (!%p338_p2), 0   ;;  %s4110_s23 = smov (!%p338_p2), 18   ;;  %v1454_v22 = vld [vmem:[%s4812_s2] sm:$0xff] (!%p338_p2) }
   0x6   : > { %341 = sbr.rel (%p338_p2) target bundleno = 1352 (0x548), region = 64  ;;  %3718 = vmatprep.subr.bf16.mxu1 (!%p338_p2), %v4107_v0  ;;  %389 = vst [vmem:[#allocation2] sm:$0xff] (!%p338_p2), %v4107_v0  ;;  %392 = vst [vmem:[#allocation2 + $0x18] sm:$0xff] (!%p338_p2), %v4107_v0  ;;  %470 = vmatprep.mubr.bf16.mxu0 (!%p338_p2), %v4108_v1  ;;  %s4111_s24 = smov (!%p338_p2), 19   ;;  %v1463_v23 = vld [vmem:[%s4813_s3] sm:$0xff] (!%p338_p2)  ;;  %vm420_vm1 = vcmask (!%p338_p2), 146432  }
   0x7   : > { %1501 = vst [vmem:[#allocation3 + $0x18] sm:$0xff] (!%p338_p2), %v4107_v0  ;;  %3720 = vmatprep.mubr.msk.bf16.mxu1 (!%p338_p2), %vm4109_vm0, %v4107_v0  ;;  %4092 = vset.pattern.permute.xlu0 (!%p338_p2), %v4108_v1  ;;  %s4112_s25 = smov (!%p338_p2), 17   ;;  %s4113_s26 = smov (!%p338_p2), 1   ;;  %vm428_vm2 = vcmask (!%p338_p2), 1041408   ;;  %vm527_vm3 = vcmask (!%p338_p2), 154624   ;;  %vm424_vm4 = vcmask (!%p338_p2), 31744  }
   0x8   : > { %4093 = vset.pattern.permute.xlu1 (!%p338_p2), %v4108_v1  ;;  %s4114_s27 = smov (!%p338_p2), 127   ;;  %s4115_s28 = smov (!%p338_p2), 111   ;;  %v3556_v33 = vld [vmem:[%s4811_s1 + $0x4] sm:$0xf] (!%p338_p2)  ;;  %vm650_vm5 = vcmask (!%p338_p2), 138240   ;;  %vm776_vm6 = vcmask (!%p338_p2), 7168  }
   0x9   : > { %s4116_s29 = smov (!%p338_p2), 110   ;;  %s4117_s30 = smov (!%p338_p2), 109   ;;  %v405_v46 = vld [vmem:[%s4811_s1] sm:$0xf] (!%p338_p2)  ;;  %v3563_v60 = vld [vmem:[%s4811_s1 + $0x8] sm:$0xf] (!%p338_p2) }
   0xa   : > { %vm1001_vm7 = vcmask (!%p338_p2), 1039360   ;;  %vm1119_vm8 = vcmask (!%p338_p2), 908288   ;;  %vm1237_vm9 = vcmask (!%p338_p2), 900096   ;;  %vm1355_vm10 = vcmask (!%p338_p2), 891904  }
   0xb   : > { %vm1496_vm11 = vcmask (!%p338_p2), 556032   ;;  %vm1532_vm12 = vcmask (!%p338_p2), 1043456   ;;  %vm1528_vm13 = vcmask (!%p338_p2), 64512   ;;  %vm3491_vm14 = vcmask (!%p338_p2), 551936  }
   0xd   : > { %s4823_s18 = smov (!%p377_p3, %s3548_s18), 1 }
   0xe   : > { %s3663_s19 = sshll.u32 %s4823_s18, 4 }
   0xf   : > { %s4200_s22 = scalar_lea.vmem %s4810_s0, %s3663_s19 }
  0x10   : > { %v394_v2 = vld [vmem:[%s4200_s22 + $0x8] sm:$0xff]  ;;  %v393_v3 = vld [vmem:[%s4200_s22] sm:$0xff] }
  0x11   : > { %v403_v4 = vpack.c.bf16 %v394_v2, %v394_v2  ;;  %v398_v5 = vcombine.high %v394_v2, %v394_v2  ;;  %v401_v6 = vpack.c.bf16 %v393_v3, %v393_v3  ;;  %v397_v7 = vcombine.high %v393_v3, %v393_v3  ;;  %v982_v10 = vld [vmem:[%s4200_s22 + $0x4] sm:$0xff]  ;;  %v983_v14 = vld [vmem:[%s4200_s22 + $0xc] sm:$0xf] }
  0x12   : > { %v985_v11 = vcombine.high %v982_v10, %v982_v10  ;;  %v4223_v12 = vpack.c.bf16 %v982_v10, %v982_v10  ;;  %v989_v15 = vpack.c.bf16 %v983_v14, %v983_v14  ;;  %v1101_v16 = vld [vmem:[%s4200_s22 + $0xc] sm:$0xf] }
  0x13   : > { %416 = vrot.lane.b32.xlu1 %v403_v4, %s4110_s23  ;;  %412 = vrot.lane.b32.xlu0 %v401_v6, %s4110_s23  ;;  %v404_v8 = vpack.c.bf16 %v398_v5, %v398_v5  ;;  %v402_v9 = vpack.c.bf16 %v397_v7, %v397_v7  ;;  %v1107_v17 = vpack.c.bf16 %v1101_v16, %v1101_v16  ;;  %v1219_v18 = vld [vmem:[%s4200_s22 + $0xc] sm:$0xf] }
  0x14   : > { %v4225_v13 = vpack.c.bf16 %v985_v11, %v985_v11  ;;  %v1225_v19 = vpack.c.bf16 %v1219_v18, %v1219_v18  ;;  %v1337_v20 = vld [vmem:[%s4200_s22 + $0xc] sm:$0xf]  ;;  %v890_v7 = vsel %vm428_vm2, %v4223_v12, 0 }
  0x15   : > { %v1343_v21 = vpack.c.bf16 %v1337_v20, %v1337_v20  ;;  %v877_v2 = vld [vmem:[%s4200_s22 + $0xc] sm:$0xf]  ;;  %v3575_v20 = vld [vmem:[%s4811_s1 + $0x14] sm:$0xf] }
  0x16   : > { %v883_v3 = vpack.c.bf16 %v877_v2, %v877_v2 }
  0x17   : > { %418 = vrot.lane.b32.xlu1 %v404_v8, %s4110_s23  ;;  %414 = vrot.lane.b32.xlu0 %v402_v9, %s4110_s23 }
  0x1b   : > { %521 = vrot.lane.b32.xlu1 %v402_v9, %s4111_s24  ;;  %519 = vrot.lane.b32.xlu0 %v401_v6, %s4111_s24 }
  0x1f   : > { %525 = vrot.lane.b32.xlu1 %v404_v8, %s4111_s24  ;;  %523 = vrot.lane.b32.xlu0 %v403_v4, %s4111_s24 }
  0x23   : > { %642 = vrot.lane.b32.xlu0 %v401_v6, %s4112_s25  ;;  %644 = vrot.lane.b32.xlu1 %v402_v9, %s4112_s25 }
  0x27   : > { %646 = vrot.lane.b32.xlu0 %v403_v4, %s4112_s25  ;;  %648 = vrot.lane.b32.xlu1 %v404_v8, %s4112_s25 }
  0x2b   : > { %768 = vrot.lane.b32.xlu0 %v401_v6, %s4113_s26  ;;  %770 = vrot.lane.b32.xlu1 %v402_v9, %s4113_s26 }
  0x2f   : > { %772 = vrot.lane.b32.xlu0 %v403_v4, %s4113_s26  ;;  %774 = vrot.lane.b32.xlu1 %v404_v8, %s4113_s26  ;;  %v3567_v4 = vld [vmem:[%s4811_s1 + $0xc] sm:$0xf]  ;;  %v896_v8 = vsel %vm428_vm2, %v883_v3, 0 }
  0x33   : > { %995 = vrot.lane.b32.xlu0 %v4223_v12, %s4114_s27  ;;  %997 = vrot.lane.b32.xlu1 %v4225_v13, %s4114_s27 }
  0x37   : > { %999 = vrot.lane.b32.xlu0 %v989_v15, %s4114_s27  ;;  %1113 = vrot.lane.b32.xlu1 %v4223_v12, %s4115_s28 }
  0x3b   : > { %1117 = vrot.lane.b32.xlu1 %v1107_v17, %s4115_s28  ;;  %1115 = vrot.lane.b32.xlu0 %v4225_v13, %s4115_s28 }
  0x3f   : > { %1231 = vrot.lane.b32.xlu0 %v4223_v12, %s4116_s29  ;;  %1233 = vrot.lane.b32.xlu1 %v4225_v13, %s4116_s29 }
  0x43   : > { %1235 = vrot.lane.b32.xlu0 %v1225_v19, %s4116_s29  ;;  %1349 = vrot.lane.b32.xlu1 %v4223_v12, %s4117_s30  ;;  %v3571_v12 = vld [vmem:[%s4811_s1 + $0x10] sm:$0xf] }
  0x47   : > { %1353 = vrot.lane.b32.xlu1 %v1343_v21, %s4117_s30  ;;  %1351 = vrot.lane.b32.xlu0 %v4225_v13, %s4117_s30 }
  0x4b   : > { %1457 = vperm.xlu0 %4092, %v1454_v22   ;;  %1466 = vperm.xlu1 %4093, %v1463_v23  }
  0x85   : > { %v417_v24 = vpop.permute.xlu1 %416  ;;  %v413_v25 = vpop.permute.xlu0 %412 }
  0x89   : > { %v419_v26 = vpop.permute.xlu1 %418  ;;  %v415_v27 = vpop.permute.xlu0 %414 }
  0x8a   : > { %v422_v28 = vsel %vm420_vm1, %v415_v27, %v417_v24  ;;  %v421_v29 = vsel %vm420_vm1, %v413_v25, %v415_v27  ;;  %v423_v30 = vsel %vm420_vm1, %v417_v24, %v419_v26 }
  0x8b   : > { %3557 = vmatprep.subr.msk.bf16.mxu0 %vm428_vm2, %v422_v28  ;;  %v430_v31 = vsel %vm428_vm2, %v421_v29, 0  ;;  %v436_v32 = vsel %vm428_vm2, %v423_v30, 0  ;;  %v3579_v28 = vld [vmem:[%s4811_s1 + $0x18] sm:$0xf] }
  0x8c   : > { %439 = vmatpush1.bf16.msra.mxu0 %v430_v31  ;;  %3719 = vmatpush3.bf16.msra.mxu1 %v436_v32 }
  0x8d   : > { %v522_v34 = vpop.permute.xlu1 %521  ;;  %v520_v35 = vpop.permute.xlu0 %519  ;;  %3724 = vmatprep.subr.bf16.mxu1 %v4107_v0 }
  0x8e   : > { %v528_v36 = vsel %vm527_vm3, %v520_v35, %v522_v34  ;;  %v3583_v35 = vld [vmem:[%s4811_s1 + $0x1c] sm:$0xf] }
  0x8f   : > { %3558 = vmatmul.mubr.msk.bf16.vlgmr.msra.gmra.mrb[0].mxu0 %vm424_vm4, %v3556_v33  ;;  %3721 = vmatmul.mubr.msk.bf16.vlgmr.msra.gmra.mrb[0].mxu1 %vm424_vm4, %v3556_v33  ;;  %v535_v37 = vsel %vm428_vm2, %v528_v36, 0 }
  0x90   : > { %575 = vmatprep.mubr.bf16.mxu0 %v4108_v1  ;;  %3726 = vmatprep.mubr.msk.bf16.mxu1 %vm4109_vm0, %v4107_v0 }
  0x91   : > { %v526_v38 = vpop.permute.xlu1 %525  ;;  %v524_v39 = vpop.permute.xlu0 %523 }
  0x92   : > { %v529_v40 = vsel %vm527_vm3, %v522_v34, %v524_v39  ;;  %v530_v41 = vsel %vm527_vm3, %v524_v39, %v526_v38  ;;  %v3587_v38 = vld [vmem:[%s4811_s1 + $0x20] sm:$0xf]  ;;  %v4118_v39 = vmov 0.0|0.0  }
  0x93   : > { %v541_v42 = vsel %vm428_vm2, %v530_v41, 0  ;;  %3560 = vmatprep.subr.msk.bf16.mxu0 %vm428_vm2, %v529_v40  ;;  %1517 = vrot.lane.b32.xlu1 %v4118_v39, %s4110_s23  ;;  %v1476_v40 = vlaneseq }
  0x94   : > { %544 = vmatpush1.bf16.msra.mxu0 %v535_v37  ;;  %3725 = vmatpush3.bf16.msra.mxu1 %v541_v42 }
  0x95   : > { %v643_v43 = vpop.permute.xlu0 %642  ;;  %v645_v44 = vpop.permute.xlu1 %644  ;;  %3730 = vmatprep.subr.bf16.mxu1 %v4107_v0  ;;  %v1477_v41 = vshrl.u32 %v1476_v40, 7 }
  0x96   : > { %v651_v45 = vsel %vm650_vm5, %v643_v43, %v645_v44 }
  0x97   : > { %v658_v49 = vsel %vm428_vm2, %v651_v45, 0  ;;  %v1478_v43 = vsub.s32 0, %v1477_v41 }
  0x99   : > { %v647_v47 = vpop.permute.xlu0 %646  ;;  %v649_v48 = vpop.permute.xlu1 %648 }
  0x9a   : > { %v652_v50 = vsel %vm650_vm5, %v645_v44, %v647_v47  ;;  %v653_v51 = vsel %vm650_vm5, %v647_v47, %v649_v48  ;;  %v1486_v44 = vsub.s32 2, %v1477_v41  ;;  %v388_v48 = vld [vmem:[%s4820_s10] sm:$0x7] }
  0x9b   : > { %3561 = vmatmul.mubr.msk.bf16.vlgmr.msra.gmra.mrb[0].mxu0 %vm424_vm4, %v405_v46  ;;  %3727 = vmatmul.mubr.msk.bf16.vlgmr.msra.gmra.mrb[0].mxu1 %vm424_vm4, %v405_v46  ;;  %v664_v52 = vsel %vm428_vm2, %v653_v51, 0 }
  0x9c   : > { %3564 = vmatprep.subr.msk.bf16.mxu0 %vm428_vm2, %v652_v50  ;;  %3731 = vmatpush3.bf16.msra.mxu1 %v664_v52 }
  0x9d   : > { %667 = vmatpush1.bf16.msra.mxu0 %v658_v49  ;;  %v769_v53 = vpop.permute.xlu0 %768  ;;  %v771_v54 = vpop.permute.xlu1 %770  ;;  %698 = vmatprep.mubr.bf16.mxu0 %v4108_v1  ;;  %v1482_v49 = vsub.s32 1, %v1477_v41 }
  0x9e   : > { %3732 = vmatprep.mubr.msk.bf16.mxu1 %vm4109_vm0, %v4107_v0  ;;  %3736 = vmatprep.subr.bf16.mxu1 %v4107_v0  ;;  %v777_v57 = vsel %vm776_vm6, %v769_v53, %v771_v54 }
  0x9f   : > { %v784_v61 = vsel %vm428_vm2, %v777_v57, 0  ;;  %v4393_v57 = vrot.slane %v388_v48, %v1478_v43 }
  0xa1   : > { %v773_v55 = vpop.permute.xlu0 %772  ;;  %v775_v56 = vpop.permute.xlu1 %774 }
  0xa2   : > { %v778_v58 = vsel %vm776_vm6, %v771_v54, %v773_v55  ;;  %v779_v59 = vsel %vm776_vm6, %v773_v55, %v775_v56 }
  0xa3   : > { %3568 = vmatprep.subr.msk.bf16.mxu0 %vm428_vm2, %v778_v58  ;;  %v790_v62 = vsel %vm428_vm2, %v779_v59, 0  ;;  %v4395_v58 = vrot.slane %v388_v48, %v1486_v44 }
  0xa5   : > { %v996_v63 = vpop.permute.xlu0 %995  ;;  %v998_v5 = vpop.permute.xlu1 %997 }
  0xa6   : > { %v1002_v11 = vsel %vm1001_vm7, %v996_v63, %v998_v5  ;;  %v4397_v63 = vrot.slane %v388_v48, %v1482_v49  ;;  %v3598_v48 = vld [vmem:[%s4814_s4 + $0x8] sm:$0xf] }
  0xa7   : > { %3565 = vmatmul.mubr.msk.bf16.vlgmr.msra.gmra.mrb[0].mxu0 %vm424_vm4, %v3563_v60  ;;  %3733 = vmatmul.mubr.msk.bf16.vlgmr.msra.gmra.mrb[0].mxu1 %vm424_vm4, %v3563_v60  ;;  %v1008_v15 = vsel %vm428_vm2, %v1002_v11, 0 }
  0xa8   : > { %793 = vmatpush1.bf16.msra.mxu0 %v784_v61  ;;  %3737 = vmatpush3.bf16.msra.mxu1 %v790_v62 }
  0xa9   : > { %824 = vmatprep.mubr.bf16.mxu0 %v4108_v1  ;;  %3738 = vmatprep.mubr.msk.bf16.mxu1 %vm4109_vm0, %v4107_v0  ;;  %v1000_v6 = vpop.permute.xlu0 %999  ;;  %v1114_v10 = vpop.permute.xlu1 %1113 }
  0xaa   : > { %3572 = vmatprep.subr.msk.bf16.mxu0 %vm428_vm2, %v4225_v13  ;;  %3742 = vmatprep.subr.bf16.mxu1 %v4107_v0  ;;  %v1003_v9 = vsel %vm1001_vm7, %v998_v5, %v1000_v6  ;;  %v1014_v16 = vsel %vm428_vm2, %v1000_v6, 0 }
  0xad   : > { %v1118_v13 = vpop.permute.xlu1 %1117  ;;  %v1116_v14 = vpop.permute.xlu0 %1115 }
  0xae   : > { %v1121_v17 = vsel %vm1119_vm8, %v1116_v14, %v1118_v13  ;;  %v1120_v19 = vsel %vm1119_vm8, %v1114_v10, %v1116_v14  ;;  %v1132_v23 = vsel %vm428_vm2, %v1118_v13, 0  ;;  %v2467_v13 = vld [vmem:[%s4815_s5] sm:$0xff] }
  0xaf   : > { %v1126_v24 = vsel %vm428_vm2, %v1120_v19, 0  ;;  %v2476_v14 = vld [vmem:[%s4816_s6] sm:$0xff] }
  0xb1   : > { %v1232_v18 = vpop.permute.xlu0 %1231  ;;  %v1234_v21 = vpop.permute.xlu1 %1233 }
  0xb2   : > { %v1238_v27 = vsel %vm1237_vm9, %v1232_v18, %v1234_v21 }
  0xb3   : > { %3569 = vmatmul.mubr.msk.bf16.vlgmr.msra.gmra.mrb[0].mxu0 %vm424_vm4, %v3567_v4  ;;  %3739 = vmatmul.mubr.msk.bf16.vlgmr.msra.gmra.mrb[0].mxu1 %vm424_vm4, %v3567_v4  ;;  %v1244_v31 = vsel %vm428_vm2, %v1238_v27, 0 }
  0xb4   : > { %899 = vmatpush1.bf16.msra.mxu0 %v890_v7  ;;  %3743 = vmatpush3.bf16.msra.mxu1 %v896_v8 }
  0xb5   : > { %930 = vmatprep.mubr.bf16.mxu0 %v4108_v1  ;;  %3744 = vmatprep.mubr.msk.bf16.mxu1 %vm4109_vm0, %v4107_v0  ;;  %v1236_v22 = vpop.permute.xlu0 %1235  ;;  %v1350_v26 = vpop.permute.xlu1 %1349 }
  0xb6   : > { %3576 = vmatprep.subr.msk.bf16.mxu0 %vm428_vm2, %v1003_v9  ;;  %3748 = vmatprep.subr.bf16.mxu1 %v4107_v0  ;;  %v1239_v25 = vsel %vm1237_vm9, %v1234_v21, %v1236_v22  ;;  %v1250_v32 = vsel %vm428_vm2, %v1236_v22, 0  ;;  %v3591_v21 = vld [vmem:[%s4814_s4 + $0x4] sm:$0xf] }
  0xb9   : > { %v1354_v29 = vpop.permute.xlu1 %1353  ;;  %v1352_v30 = vpop.permute.xlu0 %1351 }
  0xba   : > { %v1357_v33 = vsel %vm1355_vm10, %v1352_v30, %v1354_v29  ;;  %v1356_v34 = vsel %vm1355_vm10, %v1350_v26, %v1352_v30  ;;  %v1368_v36 = vsel %vm428_vm2, %v1354_v29, 0 }
  0xbb   : > { %v1362_v37 = vsel %vm428_vm2, %v1356_v34, 0 }
  0xbf   : > { %3573 = vmatmul.mubr.msk.bf16.vlgmr.msra.gmra.mrb[0].mxu0 %vm424_vm4, %v3571_v12  ;;  %3745 = vmatmul.mubr.msk.bf16.vlgmr.msra.gmra.mrb[0].mxu1 %vm424_vm4, %v3571_v12 }
  0xc0   : > { %1017 = vmatpush1.bf16.msra.mxu0 %v1008_v15  ;;  %3749 = vmatpush3.bf16.msra.mxu1 %v1014_v16 }
  0xc1   : > { %1048 = vmatprep.mubr.bf16.mxu0 %v4108_v1  ;;  %3750 = vmatprep.mubr.msk.bf16.mxu1 %vm4109_vm0, %v4107_v0 }
  0xc2   : > { %3580 = vmatprep.subr.msk.bf16.mxu0 %vm428_vm2, %v1121_v17  ;;  %3754 = vmatprep.subr.bf16.mxu1 %v4107_v0 }
  0xca   : > { %v1458_v42 = vpop.permute.xlu0 %1457  ;;  %v1467_v45 = vpop.permute.xlu1 %1466 }
  0xcb   : > { %3577 = vmatmul.mubr.msk.bf16.vlgmr.msra.gmra.mrb[0].mxu0 %vm424_vm4, %v3575_v20  ;;  %3751 = vmatmul.mubr.msk.bf16.vlgmr.msra.gmra.mrb[0].mxu1 %vm424_vm4, %v3575_v20 }
  0xcc   : > { %1135 = vmatpush1.bf16.msra.mxu0 %v1126_v24  ;;  %3755 = vmatpush3.bf16.msra.mxu1 %v1132_v23 }
  0xcd   : > { %1166 = vmatprep.mubr.bf16.mxu0 %v4108_v1  ;;  %3756 = vmatprep.mubr.msk.bf16.mxu1 %vm4109_vm0, %v4107_v0 }
  0xce   : > { %3584 = vmatprep.subr.msk.bf16.mxu0 %vm428_vm2, %v1239_v25  ;;  %3760 = vmatprep.subr.bf16.mxu1 %v4107_v0 }
  0xd7   : > { %3581 = vmatmul.mubr.msk.bf16.vlgmr.msra.gmra.mrb[0].mxu0 %vm424_vm4, %v3579_v28  ;;  %3757 = vmatmul.mubr.msk.bf16.vlgmr.msra.gmra.mrb[0].mxu1 %vm424_vm4, %v3579_v28 }
  0xd8   : > { %1253 = vmatpush1.bf16.msra.mxu0 %v1244_v31  ;;  %3761 = vmatpush3.bf16.msra.mxu1 %v1250_v32 }
  0xd9   : > { %1284 = vmatprep.mubr.bf16.mxu0 %v4108_v1  ;;  %3762 = vmatprep.mubr.msk.bf16.mxu1 %vm4109_vm0, %v4107_v0 }
  0xda   : > { %3588 = vmatprep.subr.msk.bf16.mxu0 %vm428_vm2, %v1357_v33  ;;  %3766 = vmatprep.subr.bf16.mxu1 %v4107_v0  ;;  %v1510_v33 = vld [vmem:[%s4814_s4] sm:$0xf] }
  0xe3   : > { %3585 = vmatmul.mubr.msk.bf16.vlgmr.msra.gmra.mrb[0].mxu0 %vm424_vm4, %v3583_v35  ;;  %3763 = vmatmul.mubr.msk.bf16.vlgmr.msra.gmra.mrb[0].mxu1 %vm424_vm4, %v3583_v35 }
  0xe4   : > { %1371 = vmatpush1.bf16.msra.mxu0 %v1362_v37  ;;  %3767 = vmatpush3.bf16.msra.mxu1 %v1368_v36 }
  0xe5   : > { %1402 = vmatprep.mubr.bf16.mxu0 %v4108_v1  ;;  %3768 = vmatprep.mubr.msk.bf16.mxu1 %vm4109_vm0, %v4107_v0 }
  0xe6   : > { %3772 = vmatprep.subr.bf16.mxu1 %v4107_v0 }
  0xef   : > { %3589 = vmatmul.mubr.msk.bf16.vlgmr.msra.gmra.mrb[0].mxu0 %vm424_vm4, %v3587_v38  ;;  %3769 = vmatmul.mubr.msk.bf16.vlgmr.msra.gmra.mrb[0].mxu1 %vm424_vm4, %v3587_v38 }
  0xf0   : > { %1574 = vmatprep.mubr.bf16.mxu0 %v4108_v1  ;;  %3774 = vmatprep.mubr.msk.bf16.mxu1 %vm4109_vm0, %v4107_v0 }
 0x105   : > { %v1518_v15 = vpop.permute.xlu1 %1517 }
 0x1c2   : > { %v1404_v46 = vpop.f32.mrb[0].mxu0  ;;  %v1445_v47 = vpop.f32.mrb[0].mxu1 }
 0x1c3   : > { %v1460_v50 = vmul.f32 %v1458_v42, %v1404_v46  ;;  %v1462_v51 = vmul.f32 %v1458_v42, %v1445_v47  ;;  %v1406_v52 = vpop.f32.mrb[1].mxu0  ;;  %v3770_v53 = vpop.f32.mrb[1].mxu1 }
 0x1c4   : > { %v1461_v54 = vmul.f32 %v1458_v42, %v1406_v52  ;;  %v1408_v55 = vpop.f32.mrb[2].mxu0  ;;  %v1448_v56 = vpop.f32.mrb[2].mxu1 }
 0x1c5   : > { %v1469_v59 = vadd.f32 %v1467_v45, %v1460_v50  ;;  %v1471_v60 = vadd.f32 %v1467_v45, %v1462_v51  ;;  %v1409_v61 = vpop.f32.mrb[3].mxu0  ;;  %v3771_v62 = vpop.f32.mrb[3].mxu1  ;;  %v3602_v56 = vld [vmem:[%s4814_s4 + $0xc] sm:$0xf] }
 0x1c6   : > { %v1470_v2 = vadd.f32 %v1467_v45, %v1461_v54 }
 0x1c7   : > { %v1472_v3 = vmax.f32 %v1469_v59, 0.0  ;;  %v1474_v4 = vmax.f32 %v1471_v60, 0.0 }
 0x1c8   : > { %v1473_v5 = vmax.f32 %v1470_v2, 0.0 }
 0x1c9   : > { %v1491_v6 = vmul.f32 %v4393_v57, %v1472_v3  ;;  %v1493_v7 = vmul.f32 %v4395_v58, %v1474_v4 }
 0x1ca   : > { %v1492_v8 = vmul.f32 %v4397_v63, %v1473_v5  ;;  %v3606_v5 = vld [vmem:[%s4814_s4 + $0x10] sm:$0xf] }
 0x1cb   : > { %1497 = vst.msk [vmem:[#allocation2 + $0x18] sm:$0xff] %vm1496_vm11, %v1493_v7  ;;  %v4403_v9 = vpack.c.bf16 %v1491_v6, %v1491_v6 }
 0x1cc   : > { %v4405_v10 = vpack.c.bf16 %v1492_v8, %v1492_v8 }
 0x1cd   : > { %1519 = vrot.lane.b32.xlu0 %v4403_v9, %s4110_s23  ;;  %v1951_v61 = vsel %vm1532_vm12, %v4403_v9, 0 }
 0x1ce   : > { %1521 = vrot.lane.b32.xlu1 %v4405_v10, %s4110_s23 }
 0x1d2   : > { %v1505_v11 = vld [vmem:[#allocation2 + $0x18] sm:$0xff]  ;;  %1623 = vrot.lane.b32.xlu1 %v4118_v39, %s4111_s24 }
 0x1d3   : > { %v4413_v12 = vpack.c.bf16 %v1505_v11, %v1505_v11 }
 0x1d5   : > { %1523 = vrot.lane.b32.xlu0 %v4413_v12, %s4110_s23  ;;  %v1957_v3 = vsel %vm1532_vm12, %v4413_v12, 0 }
 0x1d6   : > { %1627 = vrot.lane.b32.xlu1 %v4405_v10, %s4111_s24 }
 0x1d9   : > { %1625 = vrot.lane.b32.xlu0 %v4403_v9, %s4111_s24 }
 0x1da   : > { %1729 = vrot.lane.b32.xlu1 %v4118_v39, %s4112_s25 }
 0x1dd   : > { %1629 = vrot.lane.b32.xlu0 %v4413_v12, %s4111_s24 }
 0x1de   : > { %1733 = vrot.lane.b32.xlu1 %v4405_v10, %s4112_s25 }
 0x1e1   : > { %1731 = vrot.lane.b32.xlu0 %v4403_v9, %s4112_s25 }
 0x1e2   : > { %1838 = vrot.lane.b32.xlu1 %v4118_v39, %s4113_s26 }
 0x1e5   : > { %1735 = vrot.lane.b32.xlu0 %v4413_v12, %s4112_s25 }
 0x1e6   : > { %1842 = vrot.lane.b32.xlu1 %v4405_v10, %s4113_s26 }
 0x1e9   : > { %1840 = vrot.lane.b32.xlu0 %v4403_v9, %s4113_s26 }
 0x1ea   : > { %2045 = vrot.lane.b32.xlu1 %v4403_v9, %s4114_s27 }
 0x1ed   : > { %1844 = vrot.lane.b32.xlu0 %v4413_v12, %s4113_s26 }
 0x1ee   : > { %2049 = vrot.lane.b32.xlu1 %v4413_v12, %s4114_s27 }
 0x1f1   : > { %2047 = vrot.lane.b32.xlu0 %v4405_v10, %s4114_s27 }
 0x1f2   : > { %2153 = vrot.lane.b32.xlu1 %v4405_v10, %s4115_s28 }
 0x1f5   : > { %2151 = vrot.lane.b32.xlu0 %v4403_v9, %s4115_s28 }
 0x1f6   : > { %2257 = vrot.lane.b32.xlu1 %v4403_v9, %s4116_s29 }
 0x1f9   : > { %2155 = vrot.lane.b32.xlu0 %v4413_v12, %s4115_s28 }
 0x1fa   : > { %2261 = vrot.lane.b32.xlu1 %v4413_v12, %s4116_s29 }
 0x1fd   : > { %2259 = vrot.lane.b32.xlu0 %v4405_v10, %s4116_s29 }
 0x1fe   : > { %2365 = vrot.lane.b32.xlu1 %v4405_v10, %s4117_s30 }
 0x201   : > { %2363 = vrot.lane.b32.xlu0 %v4403_v9, %s4117_s30 }
 0x202   : > { %2470 = vperm.xlu1 %4093, %v2467_v13   ;;  %v3610_v13 = vld [vmem:[%s4814_s4 + $0x14] sm:$0xf] }
 0x205   : > { %2367 = vrot.lane.b32.xlu0 %v4413_v12, %s4117_s30 }
 0x206   : > { %2511 = vrot.lane.b32.xlu1 %v4118_v39, %s4110_s23 }
 0x209   : > { %2479 = vperm.xlu0 %4092, %v2476_v14  }
 0x23f   : > { %v1520_v16 = vpop.permute.xlu0 %1519 }
 0x240   : > { %v1525_v17 = vsel %vm420_vm1, %v1518_v15, %v1520_v16  ;;  %v1522_v18 = vpop.permute.xlu1 %1521 }
 0x241   : > { %v1534_v19 = vsel %vm1532_vm12, %v1525_v17, 0  ;;  %v1526_v20 = vsel %vm420_vm1, %v1520_v16, %v1522_v18 }
 0x242   : > { %3592 = vmatprep.subr.msk.bf16.mxu0 %vm1532_vm12, %v1526_v20 }
 0x243   : > { %1543 = vmatpush1.bf16.msra.mxu0 %v1534_v19 }
 0x244   : > { %v1624_v22 = vpop.permute.xlu1 %1623 }
 0x246   : > { %3593 = vmatmul.mubr.msk.bf16.vlgmr.msra.gmra.mrb[4].mxu0 %vm1528_vm13, %v3591_v21 }
 0x247   : > { %v1524_v23 = vpop.permute.xlu0 %1523  ;;  %1678 = vmatprep.mubr.bf16.mxu0 %v4108_v1 }
 0x248   : > { %v1527_v24 = vsel %vm420_vm1, %v1522_v18, %v1524_v23  ;;  %v1628_v25 = vpop.permute.xlu1 %1627 }
 0x249   : > { %v1540_v26 = vsel %vm1532_vm12, %v1527_v24, 0 }
 0x24a   : > { %3773 = vmatpush3.bf16.msra.mxu1 %v1540_v26 }
 0x24b   : > { %v1626_v27 = vpop.permute.xlu0 %1625  ;;  %3778 = vmatprep.subr.bf16.mxu1 %v4107_v0 }
 0x24c   : > { %v1631_v28 = vsel %vm527_vm3, %v1624_v22, %v1626_v27  ;;  %v1632_v29 = vsel %vm527_vm3, %v1626_v27, %v1628_v25  ;;  %v1730_v30 = vpop.permute.xlu1 %1729 }
 0x24d   : > { %v1638_v31 = vsel %vm1532_vm12, %v1631_v28, 0  ;;  %3775 = vmatmul.mubr.msk.bf16.vlgmr.msra.gmra.mrb[4].mxu1 %vm1528_vm13, %v3591_v21  ;;  %3595 = vmatprep.subr.msk.bf16.mxu0 %vm1532_vm12, %v1632_v29  ;;  %v3614_v21 = vld [vmem:[%s4814_s4 + $0x18] sm:$0xf]  ;;  %v3618_v28 = vld [vmem:[%s4814_s4 + $0x1c] sm:$0xf] }
 0x24e   : > { %1647 = vmatpush1.bf16.msra.mxu0 %v1638_v31  ;;  %3780 = vmatprep.mubr.msk.bf16.mxu1 %vm4109_vm0, %v4107_v0  ;;  %v3622_v31 = vld [vmem:[%s4814_s4 + $0x20] sm:$0xf] }
 0x24f   : > { %v1630_v32 = vpop.permute.xlu0 %1629 }
 0x250   : > { %v1633_v34 = vsel %vm527_vm3, %v1628_v25, %v1630_v32  ;;  %v1734_v35 = vpop.permute.xlu1 %1733 }
 0x251   : > { %v1644_v36 = vsel %vm1532_vm12, %v1633_v34, 0 }
 0x252   : > { %3779 = vmatpush3.bf16.msra.mxu1 %v1644_v36  ;;  %3596 = vmatmul.mubr.msk.bf16.vlgmr.msra.gmra.mrb[4].mxu0 %vm1528_vm13, %v1510_v33 }
 0x253   : > { %v1732_v37 = vpop.permute.xlu0 %1731  ;;  %3784 = vmatprep.subr.bf16.mxu1 %v4107_v0  ;;  %1784 = vmatprep.mubr.bf16.mxu0 %v4108_v1 }
 0x254   : > { %v1737_v38 = vsel %vm650_vm5, %v1730_v30, %v1732_v37  ;;  %v1738_v40 = vsel %vm650_vm5, %v1732_v37, %v1734_v35  ;;  %v1839_v42 = vpop.permute.xlu1 %1838 }
 0x255   : > { %v1744_v41 = vsel %vm1532_vm12, %v1737_v38, 0  ;;  %3599 = vmatprep.subr.msk.bf16.mxu0 %vm1532_vm12, %v1738_v40 }
 0x256   : > { %1753 = vmatpush1.bf16.msra.mxu0 %v1744_v41 }
 0x257   : > { %v1736_v43 = vpop.permute.xlu0 %1735 }
 0x258   : > { %v1739_v44 = vsel %vm650_vm5, %v1734_v35, %v1736_v43  ;;  %v1843_v47 = vpop.permute.xlu1 %1842 }
 0x259   : > { %v1750_v45 = vsel %vm1532_vm12, %v1739_v44, 0  ;;  %3781 = vmatmul.mubr.msk.bf16.vlgmr.msra.gmra.mrb[4].mxu1 %vm1528_vm13, %v1510_v33 }
 0x25a   : > { %3785 = vmatpush3.bf16.msra.mxu1 %v1750_v45  ;;  %3786 = vmatprep.mubr.msk.bf16.mxu1 %vm4109_vm0, %v4107_v0 }
 0x25b   : > { %v1841_v46 = vpop.permute.xlu0 %1840  ;;  %3790 = vmatprep.subr.bf16.mxu1 %v4107_v0 }
 0x25c   : > { %v1846_v49 = vsel %vm776_vm6, %v1839_v42, %v1841_v46  ;;  %v1847_v50 = vsel %vm776_vm6, %v1841_v46, %v1843_v47  ;;  %v2046_v54 = vpop.permute.xlu1 %2045 }
 0x25d   : > { %v1853_v51 = vsel %vm1532_vm12, %v1846_v49, 0  ;;  %3603 = vmatprep.subr.msk.bf16.mxu0 %vm1532_vm12, %v1847_v50 }
 0x25e   : > { %3600 = vmatmul.mubr.msk.bf16.vlgmr.msra.gmra.mrb[4].mxu0 %vm1528_vm13, %v3598_v48 }
 0x25f   : > { %v1845_v52 = vpop.permute.xlu0 %1844  ;;  %1862 = vmatpush1.bf16.msra.mxu0 %v1853_v51  ;;  %1893 = vmatprep.mubr.bf16.mxu0 %v4108_v1 }
 0x260   : > { %3607 = vmatprep.subr.msk.bf16.mxu0 %vm1532_vm12, %v4405_v10  ;;  %v1848_v53 = vsel %vm776_vm6, %v1843_v47, %v1845_v52  ;;  %v2050_v60 = vpop.permute.xlu1 %2049 }
 0x261   : > { %v1859_v55 = vsel %vm1532_vm12, %v1848_v53, 0  ;;  %v2063_v11 = vsel %vm1532_vm12, %v2050_v60, 0 }
 0x263   : > { %v2048_v59 = vpop.permute.xlu0 %2047 }
 0x264   : > { %v2052_v62 = vsel %vm1001_vm7, %v2048_v59, %v2050_v60  ;;  %v2051_v4 = vsel %vm1001_vm7, %v2046_v54, %v2048_v59  ;;  %v2154_v8 = vpop.permute.xlu1 %2153 }
 0x265   : > { %3787 = vmatmul.mubr.msk.bf16.vlgmr.msra.gmra.mrb[4].mxu1 %vm1528_vm13, %v3598_v48  ;;  %v2057_v7 = vsel %vm1532_vm12, %v2051_v4, 0 }
 0x266   : > { %3791 = vmatpush3.bf16.msra.mxu1 %v1859_v55  ;;  %3792 = vmatprep.mubr.msk.bf16.mxu1 %vm4109_vm0, %v4107_v0 }
 0x267   : > { %3796 = vmatprep.subr.bf16.mxu1 %v4107_v0  ;;  %v2152_v2 = vpop.permute.xlu0 %2151 }
 0x268   : > { %v2258_v10 = vpop.permute.xlu1 %2257  ;;  %v2157_v12 = vsel %vm1119_vm8, %v2152_v2, %v2154_v8 }
 0x269   : > { %v2163_v15 = vsel %vm1532_vm12, %v2157_v12, 0 }
 0x26a   : > { %3604 = vmatmul.mubr.msk.bf16.vlgmr.msra.gmra.mrb[4].mxu0 %vm1528_vm13, %v3602_v56 }
 0x26b   : > { %1960 = vmatpush1.bf16.msra.mxu0 %v1951_v61  ;;  %1991 = vmatprep.mubr.bf16.mxu0 %v4108_v1  ;;  %v2156_v6 = vpop.permute.xlu0 %2155 }
 0x26c   : > { %3611 = vmatprep.subr.msk.bf16.mxu0 %vm1532_vm12, %v2052_v62  ;;  %v2158_v9 = vsel %vm1119_vm8, %v2154_v8, %v2156_v6  ;;  %v2262_v16 = vpop.permute.xlu1 %2261  ;;  %v2169_v19 = vsel %vm1532_vm12, %v2156_v6, 0 }
 0x26d   : > { %v2275_v26 = vsel %vm1532_vm12, %v2262_v16, 0 }
 0x26f   : > { %v2260_v14 = vpop.permute.xlu0 %2259 }
 0x270   : > { %v2264_v17 = vsel %vm1237_vm9, %v2260_v14, %v2262_v16  ;;  %v2263_v20 = vsel %vm1237_vm9, %v2258_v10, %v2260_v14  ;;  %v2366_v24 = vpop.permute.xlu1 %2365 }
 0x271   : > { %3793 = vmatmul.mubr.msk.bf16.vlgmr.msra.gmra.mrb[4].mxu1 %vm1528_vm13, %v3602_v56  ;;  %v2269_v23 = vsel %vm1532_vm12, %v2263_v20, 0 }
 0x272   : > { %3797 = vmatpush3.bf16.msra.mxu1 %v1957_v3  ;;  %3798 = vmatprep.mubr.msk.bf16.mxu1 %vm4109_vm0, %v4107_v0  ;;  %v3626_v3 = vld [vmem:[%s4817_s7 + $0x2] sm:$0x3] }
 0x273   : > { %3802 = vmatprep.subr.bf16.mxu1 %v4107_v0  ;;  %v2364_v18 = vpop.permute.xlu0 %2363 }
 0x274   : > { %v2369_v27 = vsel %vm1355_vm10, %v2364_v18, %v2366_v24 }
 0x275   : > { %v2375_v29 = vsel %vm1532_vm12, %v2369_v27, 0 }
 0x276   : > { %3608 = vmatmul.mubr.msk.bf16.vlgmr.msra.gmra.mrb[4].mxu0 %vm1528_vm13, %v3606_v5 }
 0x277   : > { %2066 = vmatpush1.bf16.msra.mxu0 %v2057_v7  ;;  %2097 = vmatprep.mubr.bf16.mxu0 %v4108_v1  ;;  %v2368_v22 = vpop.permute.xlu0 %2367 }
 0x278   : > { %3615 = vmatprep.subr.msk.bf16.mxu0 %vm1532_vm12, %v2158_v9  ;;  %v2370_v25 = vsel %vm1355_vm10, %v2366_v24, %v2368_v22  ;;  %v2381_v30 = vsel %vm1532_vm12, %v2368_v22, 0 }
 0x27d   : > { %3799 = vmatmul.mubr.msk.bf16.vlgmr.msra.gmra.mrb[4].mxu1 %vm1528_vm13, %v3606_v5 }
 0x27e   : > { %3803 = vmatpush3.bf16.msra.mxu1 %v2063_v11  ;;  %3804 = vmatprep.mubr.msk.bf16.mxu1 %vm4109_vm0, %v4107_v0  ;;  %v4683_v11 = vld [vmem:[#allocation2] sm:$0xff] }
 0x27f   : > { %3808 = vmatprep.subr.bf16.mxu1 %v4107_v0 }
 0x281   : > { %v2471_v32 = vpop.permute.xlu1 %2470 }
 0x282   : > { %3612 = vmatmul.mubr.msk.bf16.vlgmr.msra.gmra.mrb[4].mxu0 %vm1528_vm13, %v3610_v13 }
 0x283   : > { %2172 = vmatpush1.bf16.msra.mxu0 %v2163_v15  ;;  %2203 = vmatprep.mubr.bf16.mxu0 %v4108_v1  ;;  %v2504_v15 = vld [vmem:[%s4817_s7] sm:$0x3] }
 0x284   : > { %3619 = vmatprep.subr.msk.bf16.mxu0 %vm1532_vm12, %v2264_v17 }
 0x285   : > { %v2512_v56 = vpop.permute.xlu1 %2511 }
 0x288   : > { %v2480_v36 = vpop.permute.xlu0 %2479 }
 0x289   : > { %3805 = vmatmul.mubr.msk.bf16.vlgmr.msra.gmra.mrb[4].mxu1 %vm1528_vm13, %v3610_v13 }
 0x28a   : > { %3809 = vmatpush3.bf16.msra.mxu1 %v2169_v19  ;;  %3810 = vmatprep.mubr.msk.bf16.mxu1 %vm4109_vm0, %v4107_v0 }
 0x28b   : > { %3814 = vmatprep.subr.bf16.mxu1 %v4107_v0 }
 0x28e   : > { %3616 = vmatmul.mubr.msk.bf16.vlgmr.msra.gmra.mrb[4].mxu0 %vm1528_vm13, %v3614_v21 }
 0x28f   : > { %2278 = vmatpush1.bf16.msra.mxu0 %v2269_v23  ;;  %2309 = vmatprep.mubr.bf16.mxu0 %v4108_v1 }
 0x290   : > { %3623 = vmatprep.subr.msk.bf16.mxu0 %vm1532_vm12, %v2370_v25 }
 0x295   : > { %3811 = vmatmul.mubr.msk.bf16.vlgmr.msra.gmra.mrb[4].mxu1 %vm1528_vm13, %v3614_v21 }
 0x296   : > { %3815 = vmatpush3.bf16.msra.mxu1 %v2275_v26  ;;  %3816 = vmatprep.mubr.msk.bf16.mxu1 %vm4109_vm0, %v4107_v0 }
 0x297   : > { %3820 = vmatprep.subr.bf16.mxu1 %v4107_v0 }
 0x29a   : > { %3620 = vmatmul.mubr.msk.bf16.vlgmr.msra.gmra.mrb[4].mxu0 %vm1528_vm13, %v3618_v28 }
 0x29b   : > { %2384 = vmatpush1.bf16.msra.mxu0 %v2375_v29  ;;  %2415 = vmatprep.mubr.bf16.mxu0 %v4108_v1 }
 0x2a1   : > { %3817 = vmatmul.mubr.msk.bf16.vlgmr.msra.gmra.mrb[4].mxu1 %vm1528_vm13, %v3618_v28  ;;  %v3633_v28 = vld [vmem:[%s4817_s7 + $0x4] sm:$0x3] }
 0x2a2   : > { %3821 = vmatpush3.bf16.msra.mxu1 %v2381_v30  ;;  %3822 = vmatprep.mubr.msk.bf16.mxu1 %vm4109_vm0, %v4107_v0 }
 0x2a3   : > { %3826 = vmatprep.subr.bf16.mxu1 %v4107_v0 }
 0x2a6   : > { %3624 = vmatmul.mubr.msk.bf16.vlgmr.msra.gmra.mrb[4].mxu0 %vm1528_vm13, %v3622_v31 }
 0x2a7   : > { %2566 = vmatprep.mubr.bf16.mxu0 %v4108_v1 }
 0x2ad   : > { %3823 = vmatmul.mubr.msk.bf16.vlgmr.msra.gmra.mrb[4].mxu1 %vm1528_vm13, %v3622_v31 }
 0x2ae   : > { %3828 = vmatprep.mubr.msk.bf16.mxu1 %vm4109_vm0, %v4107_v0 }
 0x379   : > { %v2417_v33 = vpop.f32.mrb[4].mxu0 }
 0x37a   : > { %v2473_v34 = vmul.f32 %v2471_v32, %v2417_v33  ;;  %v2419_v35 = vpop.f32.mrb[5].mxu0 }
 0x37b   : > { %v2474_v37 = vmul.f32 %v2471_v32, %v2419_v35  ;;  %v2421_v38 = vpop.f32.mrb[6].mxu0 }
 0x37c   : > { %v2482_v40 = vadd.f32 %v2480_v36, %v2473_v34  ;;  %v2422_v41 = vpop.f32.mrb[7].mxu0  ;;  %v3637_v38 = vld [vmem:[%s4817_s7 + $0x6] sm:$0x3] }
 0x37d   : > { %v2483_v42 = vadd.f32 %v2480_v36, %v2474_v37 }
 0x37e   : > { %v2485_v43 = vmax.f32 %v2482_v40, 0.0 }
 0x37f   : > { %v2486_v44 = vmax.f32 %v2483_v42, 0.0 }
 0x380   : > { %v2488_v45 = vmul.f32 %v2485_v43, %v4393_v57  ;;  %v2458_v46 = vpop.f32.mrb[4].mxu1 }
 0x381   : > { %v2489_v47 = vmul.f32 %v2486_v44, %v4397_v63  ;;  %v2475_v48 = vmul.f32 %v2471_v32, %v2458_v46  ;;  %v3824_v49 = vpop.f32.mrb[5].mxu1 }
 0x382   : > { %v4604_v0 = vpack.c.bf16 %v2488_v45, %v2488_v45  ;;  %v2461_v50 = vpop.f32.mrb[6].mxu1 }
 0x383   : > { %v4606_v51 = vpack.c.bf16 %v2489_v47, %v2489_v47  ;;  %v2484_v52 = vadd.f32 %v2480_v36, %v2475_v48  ;;  %v3825_v53 = vpop.f32.mrb[7].mxu1  ;;  %v3641_v47 = vld [vmem:[%s4817_s7 + $0x8] sm:$0x3] }
 0x384   : > { %2513 = vrot.lane.b32.xlu0 %v4604_v0, %s4110_s23  ;;  %v2943_v42 = vsel %vm1532_vm12, %v4604_v0, 0 }
 0x385   : > { %v2487_v54 = vmax.f32 %v2484_v52, 0.0  ;;  %2515 = vrot.lane.b32.xlu1 %v4606_v51, %s4110_s23 }
 0x387   : > { %v2490_v57 = vmul.f32 %v2487_v54, %v4395_v58  ;;  %v3468_v58 = vld [vmem:[%s4819_s9] sm:$0xf]  ;;  %v3645_v54 = vld [vmem:[%s4817_s7 + $0xa] sm:$0x3] }
 0x389   : > { %2493 = vst.msk [vmem:[#allocation3 + $0x18] sm:$0xff] %vm1496_vm11, %v2490_v57  ;;  %2615 = vrot.lane.b32.xlu1 %v4118_v39, %s4111_s24 }
 0x38d   : > { %2619 = vrot.lane.b32.xlu1 %v4606_v51, %s4111_s24 }
 0x390   : > { %v2499_v63 = vld [vmem:[#allocation3 + $0x18] sm:$0xff] }
 0x391   : > { %v4618_v55 = vpack.c.bf16 %v2499_v63, %v2499_v63  ;;  %2721 = vrot.lane.b32.xlu1 %v4118_v39, %s4112_s25 }
 0x393   : > { %2517 = vrot.lane.b32.xlu0 %v4618_v55, %s4110_s23  ;;  %v2949_v45 = vsel %vm1532_vm12, %v4618_v55, 0 }
 0x395   : > { %2725 = vrot.lane.b32.xlu1 %v4606_v51, %s4112_s25 }
 0x397   : > { %2617 = vrot.lane.b32.xlu0 %v4604_v0, %s4111_s24 }
 0x399   : > { %2830 = vrot.lane.b32.xlu1 %v4118_v39, %s4113_s26  ;;  %v3459_v39 = vld [vmem:[%s4818_s8] sm:$0xf] }
 0x39b   : > { %2621 = vrot.lane.b32.xlu0 %v4618_v55, %s4111_s24 }
 0x39d   : > { %2834 = vrot.lane.b32.xlu1 %v4606_v51, %s4113_s26 }
 0x39f   : > { %2723 = vrot.lane.b32.xlu0 %v4604_v0, %s4112_s25 }
 0x3a1   : > { %3037 = vrot.lane.b32.xlu1 %v4604_v0, %s4114_s27 }
 0x3a3   : > { %2727 = vrot.lane.b32.xlu0 %v4618_v55, %s4112_s25 }
 0x3a5   : > { %3041 = vrot.lane.b32.xlu1 %v4618_v55, %s4114_s27 }
 0x3a7   : > { %2832 = vrot.lane.b32.xlu0 %v4604_v0, %s4113_s26 }
 0x3a9   : > { %3145 = vrot.lane.b32.xlu1 %v4606_v51, %s4115_s28 }
 0x3ab   : > { %2836 = vrot.lane.b32.xlu0 %v4618_v55, %s4113_s26 }
 0x3ad   : > { %3249 = vrot.lane.b32.xlu1 %v4604_v0, %s4116_s29 }
 0x3af   : > { %3039 = vrot.lane.b32.xlu0 %v4606_v51, %s4114_s27 }
 0x3b1   : > { %3253 = vrot.lane.b32.xlu1 %v4618_v55, %s4116_s29 }
 0x3b3   : > { %3143 = vrot.lane.b32.xlu0 %v4604_v0, %s4115_s28 }
 0x3b5   : > { %3357 = vrot.lane.b32.xlu1 %v4606_v51, %s4117_s30 }
 0x3b7   : > { %3147 = vrot.lane.b32.xlu0 %v4618_v55, %s4115_s28 }
 0x3b9   : > { %3462 = vperm.xlu1 %4093, %v3459_v39  }
 0x3bb   : > { %3251 = vrot.lane.b32.xlu0 %v4606_v51, %s4116_s29  ;;  %s4072_s29 = smul.u32 12, %s4823_s18 }
 0x3bd   : > { %s386_s21 = scalar_lea.vmem %s4821_s11, %s4072_s29 }
 0x3bf   : > { %3355 = vrot.lane.b32.xlu0 %v4604_v0, %s4117_s30 }
 0x3c3   : > { %3359 = vrot.lane.b32.xlu0 %v4618_v55, %s4117_s30 }
 0x3c7   : > { %3471 = vperm.xlu0 %4092, %v3468_v58  }
 0x3f6   : > { %v2514_v59 = vpop.permute.xlu0 %2513 }
 0x3f7   : > { %v2519_v60 = vsel %vm420_vm1, %v2512_v56, %v2514_v59  ;;  %v2516_v61 = vpop.permute.xlu1 %2515 }
 0x3f8   : > { %v2526_v62 = vsel %vm1532_vm12, %v2519_v60, 0  ;;  %v2520_v2 = vsel %vm420_vm1, %v2514_v59, %v2516_v61  ;;  %v3649_v60 = vld [vmem:[%s4817_s7 + $0xc] sm:$0x3] }
 0x3f9   : > { %3627 = vmatprep.subr.msk.bf16.mxu0 %vm1532_vm12, %v2520_v2 }
 0x3fa   : > { %2535 = vmatpush1.bf16.msra.mxu0 %v2526_v62 }
 0x3fb   : > { %v2616_v4 = vpop.permute.xlu1 %2615 }
 0x3fd   : > { %3628 = vmatmul.mubr.msk.bf16.vlgmr.msra.gmra.mrb[8].mxu0 %vm1528_vm13, %v3626_v3 }
 0x3fe   : > { %2670 = vmatprep.mubr.bf16.mxu0 %v4108_v1 }
 0x3ff   : > { %v2620_v5 = vpop.permute.xlu1 %2619 }
 0x403   : > { %v2722_v9 = vpop.permute.xlu1 %2721 }
 0x405   : > { %v2518_v6 = vpop.permute.xlu0 %2517 }
 0x406   : > { %v2521_v7 = vsel %vm420_vm1, %v2516_v61, %v2518_v6  ;;  %v3653_v6 = vld [vmem:[%s4817_s7 + $0xe] sm:$0x3] }
 0x407   : > { %v2532_v8 = vsel %vm1532_vm12, %v2521_v7, 0  ;;  %v2726_v17 = vpop.permute.xlu1 %2725 }
 0x408   : > { %3827 = vmatpush3.bf16.msra.mxu1 %v2532_v8 }
 0x409   : > { %v2618_v10 = vpop.permute.xlu0 %2617  ;;  %3832 = vmatprep.subr.bf16.mxu1 %v4683_v11 }
 0x40a   : > { %v2623_v12 = vsel %vm527_vm3, %v2616_v4, %v2618_v10  ;;  %v2624_v13 = vsel %vm527_vm3, %v2618_v10, %v2620_v5  ;;  %v2494_v10 = vld [vmem:[%s4200_s22 + $0x4] sm:$0xff] }
 0x40b   : > { %v2630_v14 = vsel %vm1532_vm12, %v2623_v12, 0  ;;  %3829 = vmatmul.mubr.msk.bf16.vlgmr.msra.gmra.mrb[8].mxu1 %vm1528_vm13, %v3626_v3  ;;  %3630 = vmatprep.subr.msk.bf16.mxu0 %vm1532_vm12, %v2624_v13  ;;  %v2831_v24 = vpop.permute.xlu1 %2830 }
 0x40c   : > { %2639 = vmatpush1.bf16.msra.mxu0 %v2630_v14  ;;  %3834 = vmatprep.mubr.msk.bf16.mxu1 %vm4109_vm0, %v4683_v11 }
 0x40d   : > { %v2622_v16 = vpop.permute.xlu0 %2621 }
 0x40e   : > { %v2625_v18 = vsel %vm527_vm3, %v2620_v5, %v2622_v16 }
 0x40f   : > { %v2636_v19 = vsel %vm1532_vm12, %v2625_v18, 0  ;;  %3631 = vmatmul.mubr.msk.bf16.vlgmr.msra.gmra.mrb[8].mxu0 %vm1528_vm13, %v2504_v15  ;;  %v2835_v30 = vpop.permute.xlu1 %2834 }
 0x410   : > { %3833 = vmatpush3.bf16.msra.mxu1 %v2636_v19  ;;  %2776 = vmatprep.mubr.bf16.mxu0 %v4108_v1 }
 0x411   : > { %v2724_v20 = vpop.permute.xlu0 %2723  ;;  %3838 = vmatprep.subr.bf16.mxu1 %v4683_v11 }
 0x412   : > { %v2729_v21 = vsel %vm650_vm5, %v2722_v9, %v2724_v20  ;;  %v2730_v22 = vsel %vm650_vm5, %v2724_v20, %v2726_v17  ;;  %v3657_v9 = vld [vmem:[%s4817_s7 + $0x10] sm:$0x3] }
 0x413   : > { %v2736_v23 = vsel %vm1532_vm12, %v2729_v21, 0  ;;  %3634 = vmatprep.subr.msk.bf16.mxu0 %vm1532_vm12, %v2730_v22  ;;  %v3038_v36 = vpop.permute.xlu1 %3037 }
 0x414   : > { %2745 = vmatpush1.bf16.msra.mxu0 %v2736_v23 }
 0x415   : > { %v2728_v25 = vpop.permute.xlu0 %2727 }
 0x416   : > { %v2731_v26 = vsel %vm650_vm5, %v2726_v17, %v2728_v25  ;;  %v3478_v17 = vcombine.high %v2494_v10, %v2494_v10 }
 0x417   : > { %v2742_v27 = vsel %vm1532_vm12, %v2731_v26, 0  ;;  %3835 = vmatmul.mubr.msk.bf16.vlgmr.msra.gmra.mrb[8].mxu1 %vm1528_vm13, %v2504_v15  ;;  %v3042_v41 = vpop.permute.xlu1 %3041 }
 0x418   : > { %3839 = vmatpush3.bf16.msra.mxu1 %v2742_v27  ;;  %3840 = vmatprep.mubr.msk.bf16.mxu1 %vm4109_vm0, %v4683_v11  ;;  %v3055_v52 = vsel %vm1532_vm12, %v3042_v41, 0 }
 0x419   : > { %v2833_v29 = vpop.permute.xlu0 %2832  ;;  %3844 = vmatprep.subr.bf16.mxu1 %v4683_v11 }
 0x41a   : > { %v2838_v31 = vsel %vm776_vm6, %v2831_v24, %v2833_v29  ;;  %v2839_v32 = vsel %vm776_vm6, %v2833_v29, %v2835_v30  ;;  %v2495_v29 = vld [vmem:[%s4200_s22 + $0xc] sm:$0xf] }
 0x41b   : > { %v2845_v33 = vsel %vm1532_vm12, %v2838_v31, 0  ;;  %3638 = vmatprep.subr.msk.bf16.mxu0 %vm1532_vm12, %v2839_v32  ;;  %3635 = vmatmul.mubr.msk.bf16.vlgmr.msra.gmra.mrb[8].mxu0 %vm1528_vm13, %v3633_v28  ;;  %v3146_v0 = vpop.permute.xlu1 %3145 }
 0x41c   : > { %2854 = vmatpush1.bf16.msra.mxu0 %v2845_v33  ;;  %2885 = vmatprep.mubr.bf16.mxu0 %v4108_v1 }
 0x41d   : > { %v2837_v34 = vpop.permute.xlu0 %2836  ;;  %3642 = vmatprep.subr.msk.bf16.mxu0 %vm1532_vm12, %v4606_v51 }
 0x41e   : > { %v2840_v35 = vsel %vm776_vm6, %v2835_v30, %v2837_v34 }
 0x41f   : > { %v2851_v37 = vsel %vm1532_vm12, %v2840_v35, 0  ;;  %v3250_v51 = vpop.permute.xlu1 %3249 }
 0x421   : > { %v3040_v40 = vpop.permute.xlu0 %3039 }
 0x422   : > { %v3044_v43 = vsel %vm1001_vm7, %v3040_v40, %v3042_v41  ;;  %v3043_v46 = vsel %vm1001_vm7, %v3038_v36, %v3040_v40 }
 0x423   : > { %3841 = vmatmul.mubr.msk.bf16.vlgmr.msra.gmra.mrb[8].mxu1 %vm1528_vm13, %v3633_v28  ;;  %v3049_v49 = vsel %vm1532_vm12, %v3043_v46, 0  ;;  %v3254_v55 = vpop.permute.xlu1 %3253 }
 0x424   : > { %3845 = vmatpush3.bf16.msra.mxu1 %v2851_v37  ;;  %3846 = vmatprep.mubr.msk.bf16.mxu1 %vm4109_vm0, %v4683_v11  ;;  %v3267_v4 = vsel %vm1532_vm12, %v3254_v55, 0 }
 0x425   : > { %3850 = vmatprep.subr.bf16.mxu1 %v4683_v11  ;;  %v3144_v44 = vpop.permute.xlu0 %3143 }
 0x426   : > { %v3149_v53 = vsel %vm1119_vm8, %v3144_v44, %v3146_v0 }
 0x427   : > { %3639 = vmatmul.mubr.msk.bf16.vlgmr.msra.gmra.mrb[8].mxu0 %vm1528_vm13, %v3637_v38  ;;  %v3155_v63 = vsel %vm1532_vm12, %v3149_v53, 0  ;;  %v3358_v2 = vpop.permute.xlu1 %3357 }
 0x428   : > { %2952 = vmatpush1.bf16.msra.mxu0 %v2943_v42  ;;  %2983 = vmatprep.mubr.bf16.mxu0 %v4108_v1 }
 0x429   : > { %3646 = vmatprep.subr.msk.bf16.mxu0 %vm1532_vm12, %v3044_v43  ;;  %v3148_v48 = vpop.permute.xlu0 %3147 }
 0x42a   : > { %v3150_v50 = vsel %vm1119_vm8, %v3146_v0, %v3148_v48  ;;  %v3161_v56 = vsel %vm1532_vm12, %v3148_v48, 0 }
 0x42d   : > { %v3252_v57 = vpop.permute.xlu0 %3251 }
 0x42e   : > { %v3256_v39 = vsel %vm1237_vm9, %v3252_v57, %v3254_v55  ;;  %v3255_v59 = vsel %vm1237_vm9, %v3250_v51, %v3252_v57 }
 0x42f   : > { %3847 = vmatmul.mubr.msk.bf16.vlgmr.msra.gmra.mrb[8].mxu1 %vm1528_vm13, %v3637_v38  ;;  %v3261_v62 = vsel %vm1532_vm12, %v3255_v59, 0 }
 0x430   : > { %3851 = vmatpush3.bf16.msra.mxu1 %v2949_v45  ;;  %3852 = vmatprep.mubr.msk.bf16.mxu1 %vm4109_vm0, %v4683_v11 }
 0x431   : > { %3856 = vmatprep.subr.bf16.mxu1 %v4683_v11  ;;  %v3356_v58 = vpop.permute.xlu0 %3355 }
 0x432   : > { %v3361_v5 = vsel %vm1355_vm10, %v3356_v58, %v3358_v2 }
 0x433   : > { %3643 = vmatmul.mubr.msk.bf16.vlgmr.msra.gmra.mrb[8].mxu0 %vm1528_vm13, %v3641_v47  ;;  %v3367_v7 = vsel %vm1532_vm12, %v3361_v5, 0 }
 0x434   : > { %3058 = vmatpush1.bf16.msra.mxu0 %v3049_v49  ;;  %3089 = vmatprep.mubr.bf16.mxu0 %v4108_v1 }
 0x435   : > { %3650 = vmatprep.subr.msk.bf16.mxu0 %vm1532_vm12, %v3150_v50  ;;  %v3360_v61 = vpop.permute.xlu0 %3359 }
 0x436   : > { %v3362_v3 = vsel %vm1355_vm10, %v3358_v2, %v3360_v61  ;;  %v3373_v8 = vsel %vm1532_vm12, %v3360_v61, 0 }
 0x438   : > { %v3463_v12 = vpop.permute.xlu1 %3462 }
 0x43b   : > { %3853 = vmatmul.mubr.msk.bf16.vlgmr.msra.gmra.mrb[8].mxu1 %vm1528_vm13, %v3641_v47 }
 0x43c   : > { %3857 = vmatpush3.bf16.msra.mxu1 %v3055_v52  ;;  %3858 = vmatprep.mubr.msk.bf16.mxu1 %vm4109_vm0, %v4683_v11 }
 0x43d   : > { %3862 = vmatprep.subr.bf16.mxu1 %v4683_v11 }
 0x43f   : > { %3647 = vmatmul.mubr.msk.bf16.vlgmr.msra.gmra.mrb[8].mxu0 %vm1528_vm13, %v3645_v54 }
 0x440   : > { %3164 = vmatpush1.bf16.msra.mxu0 %v3155_v63  ;;  %3195 = vmatprep.mubr.bf16.mxu0 %v4108_v1 }
 0x441   : > { %3654 = vmatprep.subr.msk.bf16.mxu0 %vm1532_vm12, %v3256_v39 }
 0x446   : > { %v3472_v15 = vpop.permute.xlu0 %3471 }
 0x447   : > { %3859 = vmatmul.mubr.msk.bf16.vlgmr.msra.gmra.mrb[8].mxu1 %vm1528_vm13, %v3645_v54 }
 0x448   : > { %3863 = vmatpush3.bf16.msra.mxu1 %v3161_v56  ;;  %3864 = vmatprep.mubr.msk.bf16.mxu1 %vm4109_vm0, %v4683_v11 }
 0x449   : > { %3868 = vmatprep.subr.bf16.mxu1 %v4683_v11 }
 0x44b   : > { %3651 = vmatmul.mubr.msk.bf16.vlgmr.msra.gmra.mrb[8].mxu0 %vm1528_vm13, %v3649_v60 }
 0x44c   : > { %3270 = vmatpush1.bf16.msra.mxu0 %v3261_v62  ;;  %3301 = vmatprep.mubr.bf16.mxu0 %v4108_v1 }
 0x44d   : > { %3658 = vmatprep.subr.msk.bf16.mxu0 %vm1532_vm12, %v3362_v3 }
 0x453   : > { %3865 = vmatmul.mubr.msk.bf16.vlgmr.msra.gmra.mrb[8].mxu1 %vm1528_vm13, %v3649_v60 }
 0x454   : > { %3869 = vmatpush3.bf16.msra.mxu1 %v3267_v4  ;;  %3870 = vmatprep.mubr.msk.bf16.mxu1 %vm4109_vm0, %v4683_v11 }
 0x455   : > { %3874 = vmatprep.subr.bf16.mxu1 %v4683_v11 }
 0x457   : > { %3655 = vmatmul.mubr.msk.bf16.vlgmr.msra.gmra.mrb[8].mxu0 %vm1528_vm13, %v3653_v6 }
 0x458   : > { %3376 = vmatpush1.bf16.msra.mxu0 %v3367_v7  ;;  %3407 = vmatprep.mubr.bf16.mxu0 %v4108_v1 }
 0x45f   : > { %3871 = vmatmul.mubr.msk.bf16.vlgmr.msra.gmra.mrb[8].mxu1 %vm1528_vm13, %v3653_v6 }
 0x460   : > { %3875 = vmatpush3.bf16.msra.mxu1 %v3373_v8  ;;  %3876 = vmatprep.mubr.msk.bf16.mxu1 %vm4109_vm0, %v4683_v11 }
 0x463   : > { %3659 = vmatmul.mubr.msk.bf16.vlgmr.msra.gmra.mrb[8].mxu0 %vm1528_vm13, %v3657_v9 }
 0x46b   : > { %3877 = vmatmul.mubr.msk.bf16.vlgmr.msra.gmra.mrb[8].mxu1 %vm1528_vm13, %v3657_v9 }
 0x536   : > { %v3409_v1 = vpop.f32.mrb[8].mxu0 }
 0x537   : > { %v3465_v13 = vmul.f32 %v3463_v12, %v3409_v1  ;;  %v3411_v14 = vpop.f32.mrb[9].mxu0 }
 0x538   : > { %v3466_v16 = vmul.f32 %v3463_v12, %v3411_v14  ;;  %v3413_v18 = vpop.f32.mrb[10].mxu0 }
 0x539   : > { %v3474_v19 = vadd.f32 %v3472_v15, %v3465_v13  ;;  %v3414_v20 = vpop.f32.mrb[11].mxu0 }
 0x53a   : > { %v3475_v21 = vadd.f32 %v3472_v15, %v3466_v16 }
 0x53b   : > { %v3480_v22 = vadd.f32 %v3474_v19, %v2494_v10 }
 0x53c   : > { %v3481_v11 = vadd.f32 %v3478_v17, %v3475_v21 }
 0x53d   : > { %v3483_v23 = vmax.f32 %v3480_v22, 0.0 }
 0x53e   : > { %v3484_v24 = vmax.f32 %v3481_v11, 0.0  ;;  %v3450_v25 = vpop.f32.mrb[8].mxu1 }
 0x53f   : > { %v3467_v26 = vmul.f32 %v3463_v12, %v3450_v25  ;;  %v3878_v27 = vpop.f32.mrb[9].mxu1 }
 0x540   : > { %v3488_v28 = vcombine.low %v3483_v23, %v3484_v24  ;;  %v3453_v30 = vpop.f32.mrb[10].mxu1 }
 0x541   : > { %v3476_v31 = vadd.f32 %v3472_v15, %v3467_v26  ;;  %v3879_v32 = vpop.f32.mrb[11].mxu1 }
 0x542   : > { %3490 = vst [vmem:[%s386_s21] sm:$0xff] %v3488_v28 }
 0x543   : > { %v3482_v33 = vadd.f32 %v3476_v31, %v2495_v29 }
 0x545   : > { %v3485_v34 = vmax.f32 %v3482_v33, 0.0 }
 0x547   : > { %3492 = vst.msk [vmem:[%s386_s21 + $0x8] sm:$0xf] %vm3491_vm14, %v3485_v34 }
 0x548 PF: > { %s21_s17 = sadd.s32 1, %s4105_s17  }
 0x549   : > { %p18_p4 = scmp.ge.s32.totalorder %s21_s17, 4  }
 0x54b   :  { %20 = sbr.rel (!%p18_p4) target bundleno = 1 (0x1), region = 118 }

</bundles_post_ra>
